<compile_context>
chip_gen: v7x
topology: tpu7x:2x2x1
jax: 0.10.0
libtpu: 0.0.40
codegen_flags: <defaults>
</compile_context>

<pallas_src>
import functools
import math

import jax
import jax.numpy as jnp
from jax.experimental import pallas as pl
from jax.experimental.pallas import tpu as pltpu


# ---------------------------------------------------------------------------
# Pallas kernel
# ---------------------------------------------------------------------------

def _elu(x):
    # ELU(alpha=1): x for x > 0, exp(x) - 1 otherwise (exp goes to the EUP).
    return jnp.where(x > 0, x, jnp.exp(x) - 1.0)


def autoencoder_kernel(x_ref,
                       e1w_ref, e1b_ref, e2w_ref, e2b_ref, e3w_ref, e3b_ref,
                       d1w_ref, d1b_ref, d2w_ref, d2b_ref, d3w_ref, d3b_ref,
                       o_ref, *, input_len, input_dim):
    """Fused encoder + decoder + dim-2 softmax. Whole batch per call."""
    x = x_ref[...]                                                       # [B, L*D]

    # ---- encoder: Linear(L*D,300) ELU Linear(300,100) ELU Linear(100,enc) ----
    h = jnp.dot(x, e1w_ref[...], preferred_element_type=jnp.float32) + e1b_ref[...]
    h = _elu(h)
    h = jnp.dot(h, e2w_ref[...], preferred_element_type=jnp.float32) + e2b_ref[...]
    h = _elu(h)
    z = jnp.dot(h, e3w_ref[...], preferred_element_type=jnp.float32) + e3b_ref[...]

    # ---- decoder: Linear(enc,100) ELU Linear(100,300) ELU Linear(300,L*D) ----
    h = jnp.dot(z, d1w_ref[...], preferred_element_type=jnp.float32) + d1b_ref[...]
    h = _elu(h)
    h = jnp.dot(h, d2w_ref[...], preferred_element_type=jnp.float32) + d2b_ref[...]
    h = _elu(h)
    dec = jnp.dot(h, d3w_ref[...], preferred_element_type=jnp.float32) + d3b_ref[...]  # [B, L*D]

    # ---- softmax over dim=2: each contiguous group of `input_dim` lanes -----
    # Static per-position loop uses only lane slicing + 2-D stores; avoids an
    # in-kernel reshape (which could force an expensive relayout).
    for l in range(input_len):
        g = dec[:, l * input_dim:(l + 1) * input_dim]                    # [B, D]
        m = jnp.max(g, axis=-1, keepdims=True)
        p = jnp.exp(g - m)
        s = jnp.sum(p, axis=-1, keepdims=True)
        o_ref[:, l, :] = p * pl.reciprocal(s, approx=True)               # EUP recip


# ---------------------------------------------------------------------------
# Wrapper
# ---------------------------------------------------------------------------

def padding_autoencoder_forward(padded_input, params, input_len, input_dim):
    B = padded_input.shape[0]
    # `.view(batch_size, input_len * input_dim)` equivalent (plain-JAX glue).
    x2d = padded_input.reshape(B, input_len * input_dim)
    args = (x2d,) + tuple(params)
    kernel = functools.partial(autoencoder_kernel,
                               input_len=input_len, input_dim=input_dim)
    # Single fused call, no grid: whole model lives in VMEM for the duration.
    # TODO(synk): on v7x a 2-way "parallel" batch-split grid would occupy both
    # TensorCores; at B=2 and sub-microsecond compute the split is not worth it.
    return pl.pallas_call(
        kernel,
        out_shape=jax.ShapeDtypeStruct((B, input_len, input_dim), jnp.float32),
        in_specs=[pl.BlockSpec(memory_space=pltpu.MemorySpace.VMEM) for _ in args],
        out_specs=pl.BlockSpec(memory_space=pltpu.MemorySpace.VMEM),
    )(*args)


# ---------------------------------------------------------------------------
# Parameter initialization (PyTorch-like stats, weights pre-transposed)
# ---------------------------------------------------------------------------

def init_linear(key, in_f, out_f):
    """nn.Linear init; weight stored pre-transposed as [in_features, out_features]."""
    kw, kb = jax.random.split(key)
    bound = 1.0 / math.sqrt(in_f)
    w = jax.random.uniform(kw, (in_f, out_f), jnp.float32, -bound, bound)
    b = jax.random.uniform(kb, (1, out_f), jnp.float32, -bound, bound)
    return w, b


def init_autoencoder(key, input_len, input_dim, encoding_dim):
    flat = input_len * input_dim
    ks = jax.random.split(key, 6)
    e1w, e1b = init_linear(ks[0], flat, 300)
    e2w, e2b = init_linear(ks[1], 300, 100)
    e3w, e3b = init_linear(ks[2], 100, encoding_dim)
    d1w, d1b = init_linear(ks[3], encoding_dim, 100)
    d2w, d2b = init_linear(ks[4], 100, 300)
    d3w, d3b = init_linear(ks[5], 300, flat)
    return (e1w, e1b, e2w, e2b, e3w, e3b, d1w, d1b, d2w, d2b, d3w, d3b)


# ---------------------------------------------------------------------------
# Pure-JAX reference (for sanity checking the fused kernel)
# ---------------------------------------------------------------------------

def reference_forward(padded_input, params, input_len, input_dim):
    (e1w, e1b, e2w, e2b, e3w, e3b, d1w, d1b, d2w, d2b, d3w, d3b) = params
    B = padded_input.shape[0]
    x = padded_input.reshape(B, input_len * input_dim)
    h = jax.nn.elu(x @ e1w + e1b)
    h = jax.nn.elu(h @ e2w + e2b)
    z = h @ e3w + e3b
    h = jax.nn.elu(z @ d1w + d1b)
    h = jax.nn.elu(h @ d2w + d2b)
    dec = h @ d3w + d3b
    return jax.nn.softmax(dec.reshape(B, input_len, input_dim), axis=2)


# ---------------------------------------------------------------------------
# Demo
# ---------------------------------------------------------------------------

if __name__ == "__main__":
    INPUT_LEN = 16      # padded sequence length
    INPUT_DIM = 21      # 20 amino acids + padding symbol (one-hot)
    ENCODING_DIM = 32
    B = 2

    key = jax.random.PRNGKey(0)
    k_par, k_tok, k_len = jax.random.split(key, 3)
    params = init_autoencoder(k_par, INPUT_LEN, INPUT_DIM, ENCODING_DIM)

    # Deterministic synthetic one-hot padded sequences (padding rows all zero).
    toks = jax.random.randint(k_tok, (B, INPUT_LEN), 0, INPUT_DIM)
    lens = jax.random.randint(k_len, (B,), 3, INPUT_LEN + 1)
    valid = jnp.arange(INPUT_LEN)[None, :] < lens[:, None]
    padded_input = jax.nn.one_hot(toks, INPUT_DIM, dtype=jnp.float32)
    padded_input = padded_input * valid[:, :, None].astype(jnp.float32)

    out = padding_autoencoder_forward(padded_input, params, INPUT_LEN, INPUT_DIM)
    out = jax.block_until_ready(out)

    assert out.shape == (B, INPUT_LEN, INPUT_DIM)
    assert bool(jnp.all(jnp.isfinite(out)))
    # dim-2 softmax rows must sum to ~1 (approx reciprocal => loose tolerance).
    assert bool(jnp.allclose(jnp.sum(out, axis=2), 1.0, atol=5e-3))
    ref = reference_forward(padded_input, params, INPUT_LEN, INPUT_DIM)
    assert bool(jnp.allclose(out, ref, atol=5e-3, rtol=1e-2))
    print("KERNEL_OK")
</pallas_src>

<mosaic_0001>
module attributes {stable_mosaic.version = 11 : i64} {
  func.func @autoencoder_kernel(%arg0: memref<2x336xf32, #tpu.memory_space<vmem>>, %arg1: memref<336x300xf32, #tpu.memory_space<vmem>>, %arg2: memref<1x300xf32, #tpu.memory_space<vmem>>, %arg3: memref<300x100xf32, #tpu.memory_space<vmem>>, %arg4: memref<1x100xf32, #tpu.memory_space<vmem>>, %arg5: memref<100x32xf32, #tpu.memory_space<vmem>>, %arg6: memref<1x32xf32, #tpu.memory_space<vmem>>, %arg7: memref<32x100xf32, #tpu.memory_space<vmem>>, %arg8: memref<1x100xf32, #tpu.memory_space<vmem>>, %arg9: memref<100x300xf32, #tpu.memory_space<vmem>>, %arg10: memref<1x300xf32, #tpu.memory_space<vmem>>, %arg11: memref<300x336xf32, #tpu.memory_space<vmem>>, %arg12: memref<1x336xf32, #tpu.memory_space<vmem>>, %arg13: memref<2x16x21xf32, #tpu.memory_space<vmem>>) attributes {dimension_semantics = [], scalar_prefetch = 0 : i64, scratch_operands = 0 : i64, tpu.core_type = #tpu.core_type<tc>} {
    %c0 = arith.constant 0 : index
    %c0_0 = arith.constant 0 : index
    %0 = vector.load %arg0[%c0, %c0_0] : memref<2x336xf32, #tpu.memory_space<vmem>>, vector<2x336xf32>
    %c0_1 = arith.constant 0 : index
    %c0_2 = arith.constant 0 : index
    %1 = vector.load %arg1[%c0_1, %c0_2] : memref<336x300xf32, #tpu.memory_space<vmem>>, vector<336x300xf32>
    %cst = arith.constant dense<0.000000e+00> : vector<2x300xf32>
    %2 = tpu.matmul %0, %1, %cst {dimension_numbers = #tpu.dot_dimension_numbers<[1], [0], [0], [1], [0, 0, 1, 1], [], []>} : vector<2x336xf32>, vector<336x300xf32>, vector<2x300xf32> -> vector<2x300xf32>
    %c0_3 = arith.constant 0 : index
    %c0_4 = arith.constant 0 : index
    %3 = vector.load %arg2[%c0_3, %c0_4] : memref<1x300xf32, #tpu.memory_space<vmem>>, vector<1x300xf32>
    %4 = vector.broadcast %3 : vector<1x300xf32> to vector<2x300xf32>
    %5 = arith.addf %2, %4 : vector<2x300xf32>
    %cst_5 = arith.constant 0.000000e+00 : f32
    %6 = vector.broadcast %cst_5 : f32 to vector<2x300xf32>
    %7 = arith.cmpf ogt, %5, %6 : vector<2x300xf32>
    %8 = math.exp %5 : vector<2x300xf32>
    %cst_6 = arith.constant 1.000000e+00 : f32
    %9 = vector.broadcast %cst_6 : f32 to vector<2x300xf32>
    %10 = arith.subf %8, %9 : vector<2x300xf32>
    %11 = arith.select %7, %5, %10 : vector<2x300xi1>, vector<2x300xf32>
    %c0_7 = arith.constant 0 : index
    %c0_8 = arith.constant 0 : index
    %12 = vector.load %arg3[%c0_7, %c0_8] : memref<300x100xf32, #tpu.memory_space<vmem>>, vector<300x100xf32>
    %cst_9 = arith.constant dense<0.000000e+00> : vector<2x100xf32>
    %13 = tpu.matmul %11, %12, %cst_9 {dimension_numbers = #tpu.dot_dimension_numbers<[1], [0], [0], [1], [0, 0, 1, 1], [], []>} : vector<2x300xf32>, vector<300x100xf32>, vector<2x100xf32> -> vector<2x100xf32>
    %c0_10 = arith.constant 0 : index
    %c0_11 = arith.constant 0 : index
    %14 = vector.load %arg4[%c0_10, %c0_11] : memref<1x100xf32, #tpu.memory_space<vmem>>, vector<1x100xf32>
    %15 = vector.broadcast %14 : vector<1x100xf32> to vector<2x100xf32>
    %16 = arith.addf %13, %15 : vector<2x100xf32>
    %cst_12 = arith.constant 0.000000e+00 : f32
    %17 = vector.broadcast %cst_12 : f32 to vector<2x100xf32>
    %18 = arith.cmpf ogt, %16, %17 : vector<2x100xf32>
    %19 = math.exp %16 : vector<2x100xf32>
    %cst_13 = arith.constant 1.000000e+00 : f32
    %20 = vector.broadcast %cst_13 : f32 to vector<2x100xf32>
    %21 = arith.subf %19, %20 : vector<2x100xf32>
    %22 = arith.select %18, %16, %21 : vector<2x100xi1>, vector<2x100xf32>
    %c0_14 = arith.constant 0 : index
    %c0_15 = arith.constant 0 : index
    %23 = vector.load %arg5[%c0_14, %c0_15] : memref<100x32xf32, #tpu.memory_space<vmem>>, vector<100x32xf32>
    %cst_16 = arith.constant dense<0.000000e+00> : vector<2x32xf32>
    %24 = tpu.matmul %22, %23, %cst_16 {dimension_numbers = #tpu.dot_dimension_numbers<[1], [0], [0], [1], [0, 0, 1, 1], [], []>} : vector<2x100xf32>, vector<100x32xf32>, vector<2x32xf32> -> vector<2x32xf32>
    %c0_17 = arith.constant 0 : index
    %c0_18 = arith.constant 0 : index
    %25 = vector.load %arg6[%c0_17, %c0_18] : memref<1x32xf32, #tpu.memory_space<vmem>>, vector<1x32xf32>
    %26 = vector.broadcast %25 : vector<1x32xf32> to vector<2x32xf32>
    %27 = arith.addf %24, %26 : vector<2x32xf32>
    %c0_19 = arith.constant 0 : index
    %c0_20 = arith.constant 0 : index
    %28 = vector.load %arg7[%c0_19, %c0_20] : memref<32x100xf32, #tpu.memory_space<vmem>>, vector<32x100xf32>
    %cst_21 = arith.constant dense<0.000000e+00> : vector<2x100xf32>
    %29 = tpu.matmul %27, %28, %cst_21 {dimension_numbers = #tpu.dot_dimension_numbers<[1], [0], [0], [1], [0, 0, 1, 1], [], []>} : vector<2x32xf32>, vector<32x100xf32>, vector<2x100xf32> -> vector<2x100xf32>
    %c0_22 = arith.constant 0 : index
    %c0_23 = arith.constant 0 : index
    %30 = vector.load %arg8[%c0_22, %c0_23] : memref<1x100xf32, #tpu.memory_space<vmem>>, vector<1x100xf32>
    %31 = vector.broadcast %30 : vector<1x100xf32> to vector<2x100xf32>
    %32 = arith.addf %29, %31 : vector<2x100xf32>
    %cst_24 = arith.constant 0.000000e+00 : f32
    %33 = vector.broadcast %cst_24 : f32 to vector<2x100xf32>
    %34 = arith.cmpf ogt, %32, %33 : vector<2x100xf32>
    %35 = math.exp %32 : vector<2x100xf32>
    %cst_25 = arith.constant 1.000000e+00 : f32
    %36 = vector.broadcast %cst_25 : f32 to vector<2x100xf32>
    %37 = arith.subf %35, %36 : vector<2x100xf32>
    %38 = arith.select %34, %32, %37 : vector<2x100xi1>, vector<2x100xf32>
    %c0_26 = arith.constant 0 : index
    %c0_27 = arith.constant 0 : index
    %39 = vector.load %arg9[%c0_26, %c0_27] : memref<100x300xf32, #tpu.memory_space<vmem>>, vector<100x300xf32>
    %cst_28 = arith.constant dense<0.000000e+00> : vector<2x300xf32>
    %40 = tpu.matmul %38, %39, %cst_28 {dimension_numbers = #tpu.dot_dimension_numbers<[1], [0], [0], [1], [0, 0, 1, 1], [], []>} : vector<2x100xf32>, vector<100x300xf32>, vector<2x300xf32> -> vector<2x300xf32>
    %c0_29 = arith.constant 0 : index
    %c0_30 = arith.constant 0 : index
    %41 = vector.load %arg10[%c0_29, %c0_30] : memref<1x300xf32, #tpu.memory_space<vmem>>, vector<1x300xf32>
    %42 = vector.broadcast %41 : vector<1x300xf32> to vector<2x300xf32>
    %43 = arith.addf %40, %42 : vector<2x300xf32>
    %cst_31 = arith.constant 0.000000e+00 : f32
    %44 = vector.broadcast %cst_31 : f32 to vector<2x300xf32>
    %45 = arith.cmpf ogt, %43, %44 : vector<2x300xf32>
    %46 = math.exp %43 : vector<2x300xf32>
    %cst_32 = arith.constant 1.000000e+00 : f32
    %47 = vector.broadcast %cst_32 : f32 to vector<2x300xf32>
    %48 = arith.subf %46, %47 : vector<2x300xf32>
    %49 = arith.select %45, %43, %48 : vector<2x300xi1>, vector<2x300xf32>
    %c0_33 = arith.constant 0 : index
    %c0_34 = arith.constant 0 : index
    %50 = vector.load %arg11[%c0_33, %c0_34] : memref<300x336xf32, #tpu.memory_space<vmem>>, vector<300x336xf32>
    %cst_35 = arith.constant dense<0.000000e+00> : vector<2x336xf32>
    %51 = tpu.matmul %49, %50, %cst_35 {dimension_numbers = #tpu.dot_dimension_numbers<[1], [0], [0], [1], [0, 0, 1, 1], [], []>} : vector<2x300xf32>, vector<300x336xf32>, vector<2x336xf32> -> vector<2x336xf32>
    %c0_36 = arith.constant 0 : index
    %c0_37 = arith.constant 0 : index
    %52 = vector.load %arg12[%c0_36, %c0_37] : memref<1x336xf32, #tpu.memory_space<vmem>>, vector<1x336xf32>
    %53 = vector.broadcast %52 : vector<1x336xf32> to vector<2x336xf32>
    %54 = arith.addf %51, %53 : vector<2x336xf32>
    %55 = vector.extract_strided_slice %54 {offsets = [0, 0], sizes = [2, 21], strides = [1, 1]} : vector<2x336xf32> to vector<2x21xf32>
    %cst_38 = arith.constant dense<0xFF800000> : vector<2xf32>
    %56 = vector.multi_reduction <maximumf>, %55, %cst_38 [1] : vector<2x21xf32> to vector<2xf32>
    %57 = vector.shape_cast %56 : vector<2xf32> to vector<2x1xf32>
    %58 = vector.broadcast %57 : vector<2x1xf32> to vector<2x21xf32>
    %59 = arith.subf %55, %58 : vector<2x21xf32>
    %60 = math.exp %59 : vector<2x21xf32>
    %cst_39 = arith.constant dense<0.000000e+00> : vector<2xf32>
    %61 = vector.multi_reduction <add>, %60, %cst_39 [1] : vector<2x21xf32> to vector<2xf32>
    %62 = vector.shape_cast %61 : vector<2xf32> to vector<2x1xf32>
    %63 = tpu.reciprocal %62 {approx = true} : vector<2x1xf32> -> vector<2x1xf32>
    %64 = vector.broadcast %63 : vector<2x1xf32> to vector<2x21xf32>
    %65 = arith.mulf %60, %64 : vector<2x21xf32>
    %c0_40 = arith.constant 0 : index
    %c0_41 = arith.constant 0 : index
    %c0_42 = arith.constant 0 : index
    %66 = vector.load %arg13[%c0_40, %c0_41, %c0_42] : memref<2x16x21xf32, #tpu.memory_space<vmem>>, vector<2x1x21xf32>
    %67 = vector.shape_cast %66 : vector<2x1x21xf32> to vector<2x21xf32>
    %68 = vector.shape_cast %65 : vector<2x21xf32> to vector<2x1x21xf32>
    tpu.vector_store %arg13[%c0_40, %c0_41, %c0_42], %68 {strides = array<i32>} : memref<2x16x21xf32, #tpu.memory_space<vmem>>, vector<2x1x21xf32>,
    %69 = vector.extract_strided_slice %54 {offsets = [0, 21], sizes = [2, 21], strides = [1, 1]} : vector<2x336xf32> to vector<2x21xf32>
    %cst_43 = arith.constant dense<0xFF800000> : vector<2xf32>
    %70 = vector.multi_reduction <maximumf>, %69, %cst_43 [1] : vector<2x21xf32> to vector<2xf32>
    %71 = vector.shape_cast %70 : vector<2xf32> to vector<2x1xf32>
    %72 = vector.broadcast %71 : vector<2x1xf32> to vector<2x21xf32>
    %73 = arith.subf %69, %72 : vector<2x21xf32>
    %74 = math.exp %73 : vector<2x21xf32>
    %cst_44 = arith.constant dense<0.000000e+00> : vector<2xf32>
    %75 = vector.multi_reduction <add>, %74, %cst_44 [1] : vector<2x21xf32> to vector<2xf32>
    %76 = vector.shape_cast %75 : vector<2xf32> to vector<2x1xf32>
    %77 = tpu.reciprocal %76 {approx = true} : vector<2x1xf32> -> vector<2x1xf32>
    %78 = vector.broadcast %77 : vector<2x1xf32> to vector<2x21xf32>
    %79 = arith.mulf %74, %78 : vector<2x21xf32>
    %c0_45 = arith.constant 0 : index
    %c1 = arith.constant 1 : index
    %c0_46 = arith.constant 0 : index
    %80 = vector.load %arg13[%c0_45, %c1, %c0_46] : memref<2x16x21xf32, #tpu.memory_space<vmem>>, vector<2x1x21xf32>
    %81 = vector.shape_cast %80 : vector<2x1x21xf32> to vector<2x21xf32>
    %82 = vector.shape_cast %79 : vector<2x21xf32> to vector<2x1x21xf32>
    tpu.vector_store %arg13[%c0_45, %c1, %c0_46], %82 {strides = array<i32>} : memref<2x16x21xf32, #tpu.memory_space<vmem>>, vector<2x1x21xf32>,
    %83 = vector.extract_strided_slice %54 {offsets = [0, 42], sizes = [2, 21], strides = [1, 1]} : vector<2x336xf32> to vector<2x21xf32>
    %cst_47 = arith.constant dense<0xFF800000> : vector<2xf32>
    %84 = vector.multi_reduction <maximumf>, %83, %cst_47 [1] : vector<2x21xf32> to vector<2xf32>
    %85 = vector.shape_cast %84 : vector<2xf32> to vector<2x1xf32>
    %86 = vector.broadcast %85 : vector<2x1xf32> to vector<2x21xf32>
    %87 = arith.subf %83, %86 : vector<2x21xf32>
    %88 = math.exp %87 : vector<2x21xf32>
    %cst_48 = arith.constant dense<0.000000e+00> : vector<2xf32>
    %89 = vector.multi_reduction <add>, %88, %cst_48 [1] : vector<2x21xf32> to vector<2xf32>
    %90 = vector.shape_cast %89 : vector<2xf32> to vector<2x1xf32>
    %91 = tpu.reciprocal %90 {approx = true} : vector<2x1xf32> -> vector<2x1xf32>
    %92 = vector.broadcast %91 : vector<2x1xf32> to vector<2x21xf32>
    %93 = arith.mulf %88, %92 : vector<2x21xf32>
    %c0_49 = arith.constant 0 : index
    %c2 = arith.constant 2 : index
    %c0_50 = arith.constant 0 : index
    %94 = vector.load %arg13[%c0_49, %c2, %c0_50] : memref<2x16x21xf32, #tpu.memory_space<vmem>>, vector<2x1x21xf32>
    %95 = vector.shape_cast %94 : vector<2x1x21xf32> to vector<2x21xf32>
    %96 = vector.shape_cast %93 : vector<2x21xf32> to vector<2x1x21xf32>
    tpu.vector_store %arg13[%c0_49, %c2, %c0_50], %96 {strides = array<i32>} : memref<2x16x21xf32, #tpu.memory_space<vmem>>, vector<2x1x21xf32>,
    %97 = vector.extract_strided_slice %54 {offsets = [0, 63], sizes = [2, 21], strides = [1, 1]} : vector<2x336xf32> to vector<2x21xf32>
    %cst_51 = arith.constant dense<0xFF800000> : vector<2xf32>
    %98 = vector.multi_reduction <maximumf>, %97, %cst_51 [1] : vector<2x21xf32> to vector<2xf32>
    %99 = vector.shape_cast %98 : vector<2xf32> to vector<2x1xf32>
    %100 = vector.broadcast %99 : vector<2x1xf32> to vector<2x21xf32>
    %101 = arith.subf %97, %100 : vector<2x21xf32>
    %102 = math.exp %101 : vector<2x21xf32>
    %cst_52 = arith.constant dense<0.000000e+00> : vector<2xf32>
    %103 = vector.multi_reduction <add>, %102, %cst_52 [1] : vector<2x21xf32> to vector<2xf32>
    %104 = vector.shape_cast %103 : vector<2xf32> to vector<2x1xf32>
    %105 = tpu.reciprocal %104 {approx = true} : vector<2x1xf32> -> vector<2x1xf32>
    %106 = vector.broadcast %105 : vector<2x1xf32> to vector<2x21xf32>
    %107 = arith.mulf %102, %106 : vector<2x21xf32>
    %c0_53 = arith.constant 0 : index
    %c3 = arith.constant 3 : index
    %c0_54 = arith.constant 0 : index
    %108 = vector.load %arg13[%c0_53, %c3, %c0_54] : memref<2x16x21xf32, #tpu.memory_space<vmem>>, vector<2x1x21xf32>
    %109 = vector.shape_cast %108 : vector<2x1x21xf32> to vector<2x21xf32>
    %110 = vector.shape_cast %107 : vector<2x21xf32> to vector<2x1x21xf32>
    tpu.vector_store %arg13[%c0_53, %c3, %c0_54], %110 {strides = array<i32>} : memref<2x16x21xf32, #tpu.memory_space<vmem>>, vector<2x1x21xf32>,
    %111 = vector.extract_strided_slice %54 {offsets = [0, 84], sizes = [2, 21], strides = [1, 1]} : vector<2x336xf32> to vector<2x21xf32>
    %cst_55 = arith.constant dense<0xFF800000> : vector<2xf32>
    %112 = vector.multi_reduction <maximumf>, %111, %cst_55 [1] : vector<2x21xf32> to vector<2xf32>
    %113 = vector.shape_cast %112 : vector<2xf32> to vector<2x1xf32>
    %114 = vector.broadcast %113 : vector<2x1xf32> to vector<2x21xf32>
    %115 = arith.subf %111, %114 : vector<2x21xf32>
    %116 = math.exp %115 : vector<2x21xf32>
    %cst_56 = arith.constant dense<0.000000e+00> : vector<2xf32>
    %117 = vector.multi_reduction <add>, %116, %cst_56 [1] : vector<2x21xf32> to vector<2xf32>
    %118 = vector.shape_cast %117 : vector<2xf32> to vector<2x1xf32>
    %119 = tpu.reciprocal %118 {approx = true} : vector<2x1xf32> -> vector<2x1xf32>
    %120 = vector.broadcast %119 : vector<2x1xf32> to vector<2x21xf32>
    %121 = arith.mulf %116, %120 : vector<2x21xf32>
    %c0_57 = arith.constant 0 : index
    %c4 = arith.constant 4 : index
    %c0_58 = arith.constant 0 : index
    %122 = vector.load %arg13[%c0_57, %c4, %c0_58] : memref<2x16x21xf32, #tpu.memory_space<vmem>>, vector<2x1x21xf32>
    %123 = vector.shape_cast %122 : vector<2x1x21xf32> to vector<2x21xf32>
    %124 = vector.shape_cast %121 : vector<2x21xf32> to vector<2x1x21xf32>
    tpu.vector_store %arg13[%c0_57, %c4, %c0_58], %124 {strides = array<i32>} : memref<2x16x21xf32, #tpu.memory_space<vmem>>, vector<2x1x21xf32>,
    %125 = vector.extract_strided_slice %54 {offsets = [0, 105], sizes = [2, 21], strides = [1, 1]} : vector<2x336xf32> to vector<2x21xf32>
    %cst_59 = arith.constant dense<0xFF800000> : vector<2xf32>
    %126 = vector.multi_reduction <maximumf>, %125, %cst_59 [1] : vector<2x21xf32> to vector<2xf32>
    %127 = vector.shape_cast %126 : vector<2xf32> to vector<2x1xf32>
    %128 = vector.broadcast %127 : vector<2x1xf32> to vector<2x21xf32>
    %129 = arith.subf %125, %128 : vector<2x21xf32>
    %130 = math.exp %129 : vector<2x21xf32>
    %cst_60 = arith.constant dense<0.000000e+00> : vector<2xf32>
    %131 = vector.multi_reduction <add>, %130, %cst_60 [1] : vector<2x21xf32> to vector<2xf32>
    %132 = vector.shape_cast %131 : vector<2xf32> to vector<2x1xf32>
    %133 = tpu.reciprocal %132 {approx = true} : vector<2x1xf32> -> vector<2x1xf32>
    %134 = vector.broadcast %133 : vector<2x1xf32> to vector<2x21xf32>
    %135 = arith.mulf %130, %134 : vector<2x21xf32>
    %c0_61 = arith.constant 0 : index
    %c5 = arith.constant 5 : index
    %c0_62 = arith.constant 0 : index
    %136 = vector.load %arg13[%c0_61, %c5, %c0_62] : memref<2x16x21xf32, #tpu.memory_space<vmem>>, vector<2x1x21xf32>
    %137 = vector.shape_cast %136 : vector<2x1x21xf32> to vector<2x21xf32>
    %138 = vector.shape_cast %135 : vector<2x21xf32> to vector<2x1x21xf32>
    tpu.vector_store %arg13[%c0_61, %c5, %c0_62], %138 {strides = array<i32>} : memref<2x16x21xf32, #tpu.memory_space<vmem>>, vector<2x1x21xf32>,
    %139 = vector.extract_strided_slice %54 {offsets = [0, 126], sizes = [2, 21], strides = [1, 1]} : vector<2x336xf32> to vector<2x21xf32>
    %cst_63 = arith.constant dense<0xFF800000> : vector<2xf32>
    %140 = vector.multi_reduction <maximumf>, %139, %cst_63 [1] : vector<2x21xf32> to vector<2xf32>
    %141 = vector.shape_cast %140 : vector<2xf32> to vector<2x1xf32>
    %142 = vector.broadcast %141 : vector<2x1xf32> to vector<2x21xf32>
    %143 = arith.subf %139, %142 : vector<2x21xf32>
    %144 = math.exp %143 : vector<2x21xf32>
    %cst_64 = arith.constant dense<0.000000e+00> : vector<2xf32>
    %145 = vector.multi_reduction <add>, %144, %cst_64 [1] : vector<2x21xf32> to vector<2xf32>
    %146 = vector.shape_cast %145 : vector<2xf32> to vector<2x1xf32>
    %147 = tpu.reciprocal %146 {approx = true} : vector<2x1xf32> -> vector<2x1xf32>
    %148 = vector.broadcast %147 : vector<2x1xf32> to vector<2x21xf32>
    %149 = arith.mulf %144, %148 : vector<2x21xf32>
    %c0_65 = arith.constant 0 : index
    %c6 = arith.constant 6 : index
    %c0_66 = arith.constant 0 : index
    %150 = vector.load %arg13[%c0_65, %c6, %c0_66] : memref<2x16x21xf32, #tpu.memory_space<vmem>>, vector<2x1x21xf32>
    %151 = vector.shape_cast %150 : vector<2x1x21xf32> to vector<2x21xf32>
    %152 = vector.shape_cast %149 : vector<2x21xf32> to vector<2x1x21xf32>
    tpu.vector_store %arg13[%c0_65, %c6, %c0_66], %152 {strides = array<i32>} : memref<2x16x21xf32, #tpu.memory_space<vmem>>, vector<2x1x21xf32>,
    %153 = vector.extract_strided_slice %54 {offsets = [0, 147], sizes = [2, 21], strides = [1, 1]} : vector<2x336xf32> to vector<2x21xf32>
    %cst_67 = arith.constant dense<0xFF800000> : vector<2xf32>
    %154 = vector.multi_reduction <maximumf>, %153, %cst_67 [1] : vector<2x21xf32> to vector<2xf32>
    %155 = vector.shape_cast %154 : vector<2xf32> to vector<2x1xf32>
    %156 = vector.broadcast %155 : vector<2x1xf32> to vector<2x21xf32>
    %157 = arith.subf %153, %156 : vector<2x21xf32>
    %158 = math.exp %157 : vector<2x21xf32>
    %cst_68 = arith.constant dense<0.000000e+00> : vector<2xf32>
    %159 = vector.multi_reduction <add>, %158, %cst_68 [1] : vector<2x21xf32> to vector<2xf32>
    %160 = vector.shape_cast %159 : vector<2xf32> to vector<2x1xf32>
    %161 = tpu.reciprocal %160 {approx = true} : vector<2x1xf32> -> vector<2x1xf32>
    %162 = vector.broadcast %161 : vector<2x1xf32> to vector<2x21xf32>
    %163 = arith.mulf %158, %162 : vector<2x21xf32>
    %c0_69 = arith.constant 0 : index
    %c7 = arith.constant 7 : index
    %c0_70 = arith.constant 0 : index
    %164 = vector.load %arg13[%c0_69, %c7, %c0_70] : memref<2x16x21xf32, #tpu.memory_space<vmem>>, vector<2x1x21xf32>
    %165 = vector.shape_cast %164 : vector<2x1x21xf32> to vector<2x21xf32>
    %166 = vector.shape_cast %163 : vector<2x21xf32> to vector<2x1x21xf32>
    tpu.vector_store %arg13[%c0_69, %c7, %c0_70], %166 {strides = array<i32>} : memref<2x16x21xf32, #tpu.memory_space<vmem>>, vector<2x1x21xf32>,
    %167 = vector.extract_strided_slice %54 {offsets = [0, 168], sizes = [2, 21], strides = [1, 1]} : vector<2x336xf32> to vector<2x21xf32>
    %cst_71 = arith.constant dense<0xFF800000> : vector<2xf32>
    %168 = vector.multi_reduction <maximumf>, %167, %cst_71 [1] : vector<2x21xf32> to vector<2xf32>
    %169 = vector.shape_cast %168 : vector<2xf32> to vector<2x1xf32>
    %170 = vector.broadcast %169 : vector<2x1xf32> to vector<2x21xf32>
    %171 = arith.subf %167, %170 : vector<2x21xf32>
    %172 = math.exp %171 : vector<2x21xf32>
    %cst_72 = arith.constant dense<0.000000e+00> : vector<2xf32>
    %173 = vector.multi_reduction <add>, %172, %cst_72 [1] : vector<2x21xf32> to vector<2xf32>
    %174 = vector.shape_cast %173 : vector<2xf32> to vector<2x1xf32>
    %175 = tpu.reciprocal %174 {approx = true} : vector<2x1xf32> -> vector<2x1xf32>
    %176 = vector.broadcast %175 : vector<2x1xf32> to vector<2x21xf32>
    %177 = arith.mulf %172, %176 : vector<2x21xf32>
    %c0_73 = arith.constant 0 : index
    %c8 = arith.constant 8 : index
    %c0_74 = arith.constant 0 : index
    %178 = vector.load %arg13[%c0_73, %c8, %c0_74] : memref<2x16x21xf32, #tpu.memory_space<vmem>>, vector<2x1x21xf32>
    %179 = vector.shape_cast %178 : vector<2x1x21xf32> to vector<2x21xf32>
    %180 = vector.shape_cast %177 : vector<2x21xf32> to vector<2x1x21xf32>
    tpu.vector_store %arg13[%c0_73, %c8, %c0_74], %180 {strides = array<i32>} : memref<2x16x21xf32, #tpu.memory_space<vmem>>, vector<2x1x21xf32>,
    %181 = vector.extract_strided_slice %54 {offsets = [0, 189], sizes = [2, 21], strides = [1, 1]} : vector<2x336xf32> to vector<2x21xf32>
    %cst_75 = arith.constant dense<0xFF800000> : vector<2xf32>
    %182 = vector.multi_reduction <maximumf>, %181, %cst_75 [1] : vector<2x21xf32> to vector<2xf32>
    %183 = vector.shape_cast %182 : vector<2xf32> to vector<2x1xf32>
    %184 = vector.broadcast %183 : vector<2x1xf32> to vector<2x21xf32>
    %185 = arith.subf %181, %184 : vector<2x21xf32>
    %186 = math.exp %185 : vector<2x21xf32>
    %cst_76 = arith.constant dense<0.000000e+00> : vector<2xf32>
    %187 = vector.multi_reduction <add>, %186, %cst_76 [1] : vector<2x21xf32> to vector<2xf32>
    %188 = vector.shape_cast %187 : vector<2xf32> to vector<2x1xf32>
    %189 = tpu.reciprocal %188 {approx = true} : vector<2x1xf32> -> vector<2x1xf32>
    %190 = vector.broadcast %189 : vector<2x1xf32> to vector<2x21xf32>
    %191 = arith.mulf %186, %190 : vector<2x21xf32>
    %c0_77 = arith.constant 0 : index
    %c9 = arith.constant 9 : index
    %c0_78 = arith.constant 0 : index
    %192 = vector.load %arg13[%c0_77, %c9, %c0_78] : memref<2x16x21xf32, #tpu.memory_space<vmem>>, vector<2x1x21xf32>
    %193 = vector.shape_cast %192 : vector<2x1x21xf32> to vector<2x21xf32>
    %194 = vector.shape_cast %191 : vector<2x21xf32> to vector<2x1x21xf32>
    tpu.vector_store %arg13[%c0_77, %c9, %c0_78], %194 {strides = array<i32>} : memref<2x16x21xf32, #tpu.memory_space<vmem>>, vector<2x1x21xf32>,
    %195 = vector.extract_strided_slice %54 {offsets = [0, 210], sizes = [2, 21], strides = [1, 1]} : vector<2x336xf32> to vector<2x21xf32>
    %cst_79 = arith.constant dense<0xFF800000> : vector<2xf32>
    %196 = vector.multi_reduction <maximumf>, %195, %cst_79 [1] : vector<2x21xf32> to vector<2xf32>
    %197 = vector.shape_cast %196 : vector<2xf32> to vector<2x1xf32>
    %198 = vector.broadcast %197 : vector<2x1xf32> to vector<2x21xf32>
    %199 = arith.subf %195, %198 : vector<2x21xf32>
    %200 = math.exp %199 : vector<2x21xf32>
    %cst_80 = arith.constant dense<0.000000e+00> : vector<2xf32>
    %201 = vector.multi_reduction <add>, %200, %cst_80 [1] : vector<2x21xf32> to vector<2xf32>
    %202 = vector.shape_cast %201 : vector<2xf32> to vector<2x1xf32>
    %203 = tpu.reciprocal %202 {approx = true} : vector<2x1xf32> -> vector<2x1xf32>
    %204 = vector.broadcast %203 : vector<2x1xf32> to vector<2x21xf32>
    %205 = arith.mulf %200, %204 : vector<2x21xf32>
    %c0_81 = arith.constant 0 : index
    %c10 = arith.constant 10 : index
    %c0_82 = arith.constant 0 : index
    %206 = vector.load %arg13[%c0_81, %c10, %c0_82] : memref<2x16x21xf32, #tpu.memory_space<vmem>>, vector<2x1x21xf32>
    %207 = vector.shape_cast %206 : vector<2x1x21xf32> to vector<2x21xf32>
    %208 = vector.shape_cast %205 : vector<2x21xf32> to vector<2x1x21xf32>
    tpu.vector_store %arg13[%c0_81, %c10, %c0_82], %208 {strides = array<i32>} : memref<2x16x21xf32, #tpu.memory_space<vmem>>, vector<2x1x21xf32>,
    %209 = vector.extract_strided_slice %54 {offsets = [0, 231], sizes = [2, 21], strides = [1, 1]} : vector<2x336xf32> to vector<2x21xf32>
    %cst_83 = arith.constant dense<0xFF800000> : vector<2xf32>
    %210 = vector.multi_reduction <maximumf>, %209, %cst_83 [1] : vector<2x21xf32> to vector<2xf32>
    %211 = vector.shape_cast %210 : vector<2xf32> to vector<2x1xf32>
    %212 = vector.broadcast %211 : vector<2x1xf32> to vector<2x21xf32>
    %213 = arith.subf %209, %212 : vector<2x21xf32>
    %214 = math.exp %213 : vector<2x21xf32>
    %cst_84 = arith.constant dense<0.000000e+00> : vector<2xf32>
    %215 = vector.multi_reduction <add>, %214, %cst_84 [1] : vector<2x21xf32> to vector<2xf32>
    %216 = vector.shape_cast %215 : vector<2xf32> to vector<2x1xf32>
    %217 = tpu.reciprocal %216 {approx = true} : vector<2x1xf32> -> vector<2x1xf32>
    %218 = vector.broadcast %217 : vector<2x1xf32> to vector<2x21xf32>
    %219 = arith.mulf %214, %218 : vector<2x21xf32>
    %c0_85 = arith.constant 0 : index
    %c11 = arith.constant 11 : index
    %c0_86 = arith.constant 0 : index
    %220 = vector.load %arg13[%c0_85, %c11, %c0_86] : memref<2x16x21xf32, #tpu.memory_space<vmem>>, vector<2x1x21xf32>
    %221 = vector.shape_cast %220 : vector<2x1x21xf32> to vector<2x21xf32>
    %222 = vector.shape_cast %219 : vector<2x21xf32> to vector<2x1x21xf32>
    tpu.vector_store %arg13[%c0_85, %c11, %c0_86], %222 {strides = array<i32>} : memref<2x16x21xf32, #tpu.memory_space<vmem>>, vector<2x1x21xf32>,
    %223 = vector.extract_strided_slice %54 {offsets = [0, 252], sizes = [2, 21], strides = [1, 1]} : vector<2x336xf32> to vector<2x21xf32>
    %cst_87 = arith.constant dense<0xFF800000> : vector<2xf32>
    %224 = vector.multi_reduction <maximumf>, %223, %cst_87 [1] : vector<2x21xf32> to vector<2xf32>
    %225 = vector.shape_cast %224 : vector<2xf32> to vector<2x1xf32>
    %226 = vector.broadcast %225 : vector<2x1xf32> to vector<2x21xf32>
    %227 = arith.subf %223, %226 : vector<2x21xf32>
    %228 = math.exp %227 : vector<2x21xf32>
    %cst_88 = arith.constant dense<0.000000e+00> : vector<2xf32>
    %229 = vector.multi_reduction <add>, %228, %cst_88 [1] : vector<2x21xf32> to vector<2xf32>
    %230 = vector.shape_cast %229 : vector<2xf32> to vector<2x1xf32>
    %231 = tpu.reciprocal %230 {approx = true} : vector<2x1xf32> -> vector<2x1xf32>
    %232 = vector.broadcast %231 : vector<2x1xf32> to vector<2x21xf32>
    %233 = arith.mulf %228, %232 : vector<2x21xf32>
    %c0_89 = arith.constant 0 : index
    %c12 = arith.constant 12 : index
    %c0_90 = arith.constant 0 : index
    %234 = vector.load %arg13[%c0_89, %c12, %c0_90] : memref<2x16x21xf32, #tpu.memory_space<vmem>>, vector<2x1x21xf32>
    %235 = vector.shape_cast %234 : vector<2x1x21xf32> to vector<2x21xf32>
    %236 = vector.shape_cast %233 : vector<2x21xf32> to vector<2x1x21xf32>
    tpu.vector_store %arg13[%c0_89, %c12, %c0_90], %236 {strides = array<i32>} : memref<2x16x21xf32, #tpu.memory_space<vmem>>, vector<2x1x21xf32>,
    %237 = vector.extract_strided_slice %54 {offsets = [0, 273], sizes = [2, 21], strides = [1, 1]} : vector<2x336xf32> to vector<2x21xf32>
    %cst_91 = arith.constant dense<0xFF800000> : vector<2xf32>
    %238 = vector.multi_reduction <maximumf>, %237, %cst_91 [1] : vector<2x21xf32> to vector<2xf32>
    %239 = vector.shape_cast %238 : vector<2xf32> to vector<2x1xf32>
    %240 = vector.broadcast %239 : vector<2x1xf32> to vector<2x21xf32>
    %241 = arith.subf %237, %240 : vector<2x21xf32>
    %242 = math.exp %241 : vector<2x21xf32>
    %cst_92 = arith.constant dense<0.000000e+00> : vector<2xf32>
    %243 = vector.multi_reduction <add>, %242, %cst_92 [1] : vector<2x21xf32> to vector<2xf32>
    %244 = vector.shape_cast %243 : vector<2xf32> to vector<2x1xf32>
    %245 = tpu.reciprocal %244 {approx = true} : vector<2x1xf32> -> vector<2x1xf32>
    %246 = vector.broadcast %245 : vector<2x1xf32> to vector<2x21xf32>
    %247 = arith.mulf %242, %246 : vector<2x21xf32>
    %c0_93 = arith.constant 0 : index
    %c13 = arith.constant 13 : index
    %c0_94 = arith.constant 0 : index
    %248 = vector.load %arg13[%c0_93, %c13, %c0_94] : memref<2x16x21xf32, #tpu.memory_space<vmem>>, vector<2x1x21xf32>
    %249 = vector.shape_cast %248 : vector<2x1x21xf32> to vector<2x21xf32>
    %250 = vector.shape_cast %247 : vector<2x21xf32> to vector<2x1x21xf32>
    tpu.vector_store %arg13[%c0_93, %c13, %c0_94], %250 {strides = array<i32>} : memref<2x16x21xf32, #tpu.memory_space<vmem>>, vector<2x1x21xf32>,
    %251 = vector.extract_strided_slice %54 {offsets = [0, 294], sizes = [2, 21], strides = [1, 1]} : vector<2x336xf32> to vector<2x21xf32>
    %cst_95 = arith.constant dense<0xFF800000> : vector<2xf32>
    %252 = vector.multi_reduction <maximumf>, %251, %cst_95 [1] : vector<2x21xf32> to vector<2xf32>
    %253 = vector.shape_cast %252 : vector<2xf32> to vector<2x1xf32>
    %254 = vector.broadcast %253 : vector<2x1xf32> to vector<2x21xf32>
    %255 = arith.subf %251, %254 : vector<2x21xf32>
    %256 = math.exp %255 : vector<2x21xf32>
    %cst_96 = arith.constant dense<0.000000e+00> : vector<2xf32>
    %257 = vector.multi_reduction <add>, %256, %cst_96 [1] : vector<2x21xf32> to vector<2xf32>
    %258 = vector.shape_cast %257 : vector<2xf32> to vector<2x1xf32>
    %259 = tpu.reciprocal %258 {approx = true} : vector<2x1xf32> -> vector<2x1xf32>
    %260 = vector.broadcast %259 : vector<2x1xf32> to vector<2x21xf32>
    %261 = arith.mulf %256, %260 : vector<2x21xf32>
    %c0_97 = arith.constant 0 : index
    %c14 = arith.constant 14 : index
    %c0_98 = arith.constant 0 : index
    %262 = vector.load %arg13[%c0_97, %c14, %c0_98] : memref<2x16x21xf32, #tpu.memory_space<vmem>>, vector<2x1x21xf32>
    %263 = vector.shape_cast %262 : vector<2x1x21xf32> to vector<2x21xf32>
    %264 = vector.shape_cast %261 : vector<2x21xf32> to vector<2x1x21xf32>
    tpu.vector_store %arg13[%c0_97, %c14, %c0_98], %264 {strides = array<i32>} : memref<2x16x21xf32, #tpu.memory_space<vmem>>, vector<2x1x21xf32>,
    %265 = vector.extract_strided_slice %54 {offsets = [0, 315], sizes = [2, 21], strides = [1, 1]} : vector<2x336xf32> to vector<2x21xf32>
    %cst_99 = arith.constant dense<0xFF800000> : vector<2xf32>
    %266 = vector.multi_reduction <maximumf>, %265, %cst_99 [1] : vector<2x21xf32> to vector<2xf32>
    %267 = vector.shape_cast %266 : vector<2xf32> to vector<2x1xf32>
    %268 = vector.broadcast %267 : vector<2x1xf32> to vector<2x21xf32>
    %269 = arith.subf %265, %268 : vector<2x21xf32>
    %270 = math.exp %269 : vector<2x21xf32>
    %cst_100 = arith.constant dense<0.000000e+00> : vector<2xf32>
    %271 = vector.multi_reduction <add>, %270, %cst_100 [1] : vector<2x21xf32> to vector<2xf32>
    %272 = vector.shape_cast %271 : vector<2xf32> to vector<2x1xf32>
    %273 = tpu.reciprocal %272 {approx = true} : vector<2x1xf32> -> vector<2x1xf32>
    %274 = vector.broadcast %273 : vector<2x1xf32> to vector<2x21xf32>
    %275 = arith.mulf %270, %274 : vector<2x21xf32>
    %c0_101 = arith.constant 0 : index
    %c15 = arith.constant 15 : index
    %c0_102 = arith.constant 0 : index
    %276 = vector.load %arg13[%c0_101, %c15, %c0_102] : memref<2x16x21xf32, #tpu.memory_space<vmem>>, vector<2x1x21xf32>
    %277 = vector.shape_cast %276 : vector<2x1x21xf32> to vector<2x21xf32>
    %278 = vector.shape_cast %275 : vector<2x21xf32> to vector<2x1x21xf32>
    tpu.vector_store %arg13[%c0_101, %c15, %c0_102], %278 {strides = array<i32>} : memref<2x16x21xf32, #tpu.memory_space<vmem>>, vector<2x1x21xf32>,
    return
  }
}

</mosaic_0001>

<bundles_post_ra>
// kernel: tpu_custom_call.1
= control target key start
LH: loop header
LB: loop body
LE: loop exit
PB: predicated region body
PF: predicated region fallthrough
CT: control target
= control target key end

     0   :  { %v174_v54 = vlaneseq  ;;  %v3292_v55 = vmov 1983009808   ;;  %vm3294_vm0 = vmmov 0   ;;  %s4857_s0 = inlined_call_operand.vmem [shape: f32[2,336], index: 0, kind: input, shape index: {}]   ;;  %s4858_s1 = inlined_call_operand.vmem [shape: f32[336,300], index: 1, kind: input, shape index: {}]   ;;  %s4859_s2 = inlined_call_operand.vmem [shape: f32[1,300], index: 2, kind: input, shape index: {}]   ;;  %s4860_s3 = inlined_call_operand.vmem [shape: f32[300,100], index: 3, kind: input, shape index: {}]   ;;  %s4861_s4 = inlined_call_operand.vmem [shape: f32[1,100], index: 4, kind: input, shape index: {}]   ;;  %s4862_s5 = inlined_call_operand.vmem [shape: f32[100,32], index: 5, kind: input, shape index: {}]   ;;  %s4863_s6 = inlined_call_operand.vmem [shape: f32[1,32], index: 6, kind: input, shape index: {}]   ;;  %s4864_s7 = inlined_call_operand.vmem [shape: f32[32,100], index: 7, kind: input, shape index: {}]   ;;  %s4865_s8 = inlined_call_operand.vmem [shape: f32[1,100], index: 8, kind: input, shape index: {}]   ;;  %s4866_s9 = inlined_call_operand.vmem [shape: f32[100,300], index: 9, kind: input, shape index: {}]   ;;  %s4867_s10 = inlined_call_operand.vmem [shape: f32[1,300], index: 10, kind: input, shape index: {}]   ;;  %s4868_s11 = inlined_call_operand.vmem [shape: f32[300,336], index: 11, kind: input, shape index: {}]   ;;  %s4869_s12 = inlined_call_operand.vmem [shape: f32[1,336], index: 12, kind: input, shape index: {}]   ;;  %s4870_s13 = inlined_call_operand.hbm [shape: f32[2,16,21], index: 13, kind: output, shape index: {}]  }
   0x1   :  { %v47_v0 = vld [vmem:[%s4858_s1 + $0x8] sm:$0xff]  ;;  %v50_v1 = vld [vmem:[%s4858_s1 + $0x20] sm:$0xff]  ;;  %v49_v4 = vld [vmem:[%s4858_s1 + $0x18] sm:$0xff]  ;;  %v192_v56 = vunpack.c.l.s4 %v3292_v55 }
   0x2   :  { %v46_v2 = vld [vmem:[%s4858_s1] sm:$0xff]  ;;  %v2792_v3 = vpack.c.bf16 %v50_v1, %v47_v0  ;;  %v53_v5 = vld [vmem:[%s4858_s1 + $0x38] sm:$0xff]  ;;  %v56_v6 = vld [vmem:[%s4858_s1 + $0x50] sm:$0xff] }
   0x3   :  { %v2794_v7 = vpack.c.bf16 %v49_v4, %v46_v2  ;;  %v2796_v8 = vpack.c.bf16 %v56_v6, %v53_v5  ;;  %v52_v9 = vld [vmem:[%s4858_s1 + $0x30] sm:$0xff]  ;;  %v55_v10 = vld [vmem:[%s4858_s1 + $0x48] sm:$0xff]  ;;  %v62_v12 = vld [vmem:[%s4858_s1 + $0x80] sm:$0xff]  ;;  %v3524_v5 = vshrl.u32 %v174_v54, 7  ;;  %v193_v6 = vunpack.c.0.s8 %v192_v56 }
   0x4   :  { %v59_v11 = vld [vmem:[%s4858_s1 + $0x68] sm:$0xff]  ;;  %2793 = vmatprep.subr.bf16.mxu0 %v2792_v3  ;;  %v2798_v13 = vpack.c.bf16 %v55_v10, %v52_v9  ;;  %v58_v14 = vld [vmem:[%s4858_s1 + $0x60] sm:$0xff]  ;;  %v61_v16 = vld [vmem:[%s4858_s1 + $0x78] sm:$0xff] }
   0x5   :  { %2795 = vmatpush1.bf16.msra.mxu0 %v2794_v7  ;;  %v2800_v15 = vpack.c.bf16 %v62_v12, %v59_v11  ;;  %v96_v17 = vld [vmem:[%s4858_s1 + $0x190] sm:$0xff]  ;;  %v99_v18 = vld [vmem:[%s4858_s1 + $0x1a8] sm:$0xff]  ;;  %v65_v19 = vld [vmem:[%s4858_s1 + $0x98] sm:$0xff]  ;;  %v2802_v24 = vpack.c.bf16 %v61_v16, %v58_v14 }
   0x6   :  { %2797 = vmatprep.subr.bf16.mxu0 %v2796_v8  ;;  %v68_v20 = vld [vmem:[%s4858_s1 + $0xb0] sm:$0xff]  ;;  %v2876_v21 = vpack.c.bf16 %v99_v18, %v96_v17  ;;  %v51_v23 = vld [vmem:[%s4858_s1 + $0x28] sm:$0xff]  ;;  %v102_v27 = vld [vmem:[%s4858_s1 + $0x1c0] sm:$0xff] }
   0x7   :  { %v48_v22 = vld [vmem:[%s4858_s1 + $0x10] sm:$0xff]  ;;  %v105_v28 = vld [vmem:[%s4858_s1 + $0x1d8] sm:$0xff]  ;;  %v2804_v29 = vpack.c.bf16 %v68_v20, %v65_v19  ;;  %v67_v30 = vld [vmem:[%s4858_s1 + $0xa8] sm:$0xff]  ;;  %v3551_v19 = vsub.s32 %v193_v6, %v3524_v5 }
   0x8   :  { %v64_v25 = vld [vmem:[%s4858_s1 + $0x90] sm:$0xff]  ;;  %2877 = vmatprep.subr.bf16.mxu1 %v2876_v21  ;;  %v2878_v26 = vpack.c.bf16 %v51_v23, %v48_v22  ;;  %v2880_v31 = vpack.c.bf16 %v105_v28, %v102_v27  ;;  %v54_v32 = vld [vmem:[%s4858_s1 + $0x40] sm:$0xff]  ;;  %v57_v33 = vld [vmem:[%s4858_s1 + $0x58] sm:$0xff] }
   0x9   :  { %2799 = vmatpush1.bf16.msra.mxu0 %v2798_v13  ;;  %v71_v34 = vld [vmem:[%s4858_s1 + $0xc8] sm:$0xff]  ;;  %v74_v35 = vld [vmem:[%s4858_s1 + $0xe0] sm:$0xff]  ;;  %v2882_v36 = vpack.c.bf16 %v57_v33, %v54_v32  ;;  %v108_v37 = vld [vmem:[%s4858_s1 + $0x1f0] sm:$0xff]  ;;  %v2806_v39 = vpack.c.bf16 %v67_v30, %v64_v25 }
   0xa   :  { %2801 = vmatprep.subr.bf16.mxu0 %v2800_v15  ;;  %2879 = vmatpush3.bf16.msra.mxu1 %v2878_v26  ;;  %v111_v38 = vld [vmem:[%s4858_s1 + $0x208] sm:$0xff]  ;;  %v70_v40 = vld [vmem:[%s4858_s1 + $0xc0] sm:$0xff]  ;;  %v60_v42 = vld [vmem:[%s4858_s1 + $0x70] sm:$0xff]  ;;  %v2808_v44 = vpack.c.bf16 %v74_v35, %v71_v34 }
   0xb   :  { %2881 = vmatprep.subr.bf16.mxu1 %v2880_v31  ;;  %v2884_v41 = vpack.c.bf16 %v111_v38, %v108_v37  ;;  %v63_v43 = vld [vmem:[%s4858_s1 + $0x88] sm:$0xff]  ;;  %v73_v45 = vld [vmem:[%s4858_s1 + $0xd8] sm:$0xff]  ;;  %v114_v46 = vld [vmem:[%s4858_s1 + $0x220] sm:$0xff] }
   0xc   :  { %v117_v47 = vld [vmem:[%s4858_s1 + $0x238] sm:$0xff]  ;;  %v80_v49 = vld [vmem:[%s4858_s1 + $0x110] sm:$0xff]  ;;  %v2886_v50 = vpack.c.bf16 %v63_v43, %v60_v42  ;;  %v66_v52 = vld [vmem:[%s4858_s1 + $0xa0] sm:$0xff]  ;;  %v2810_v57 = vpack.c.bf16 %v73_v45, %v70_v40 }
   0xd   :  { %2803 = vmatpush1.bf16.msra.mxu0 %v2802_v24  ;;  %v77_v48 = vld [vmem:[%s4858_s1 + $0xf8] sm:$0xff]  ;;  %v2888_v51 = vpack.c.bf16 %v117_v47, %v114_v46  ;;  %v120_v58 = vld [vmem:[%s4858_s1 + $0x250] sm:$0xff]  ;;  %v123_v59 = vld [vmem:[%s4858_s1 + $0x268] sm:$0xff] }
   0xe   :  { %2805 = vmatprep.subr.bf16.mxu0 %v2804_v29  ;;  %2883 = vmatpush3.bf16.msra.mxu1 %v2882_v36  ;;  %v69_v53 = vld [vmem:[%s4858_s1 + $0xb8] sm:$0xff]  ;;  %v2812_v60 = vpack.c.bf16 %v80_v49, %v77_v48  ;;  %v76_v61 = vld [vmem:[%s4858_s1 + $0xf0] sm:$0xff]  ;;  %v79_v62 = vld [vmem:[%s4858_s1 + $0x108] sm:$0xff]  ;;  %v2892_v2 = vpack.c.bf16 %v123_v59, %v120_v58 }
   0xf   :  { %2885 = vmatprep.subr.bf16.mxu1 %v2884_v41  ;;  %v83_v63 = vld [vmem:[%s4858_s1 + $0x128] sm:$0xff]  ;;  %v86_v0 = vld [vmem:[%s4858_s1 + $0x140] sm:$0xff]  ;;  %v2890_v1 = vpack.c.bf16 %v69_v53, %v66_v52  ;;  %v72_v3 = vld [vmem:[%s4858_s1 + $0xd0] sm:$0xff]  ;;  %v2814_v7 = vpack.c.bf16 %v79_v62, %v76_v61 }
  0x10   :  { %v75_v4 = vld [vmem:[%s4858_s1 + $0xe8] sm:$0xff]  ;;  %v126_v8 = vld [vmem:[%s4858_s1 + $0x280] sm:$0xff]  ;;  %v129_v9 = vld [vmem:[%s4858_s1 + $0x298] sm:$0xff]  ;;  %v2816_v10 = vpack.c.bf16 %v86_v0, %v83_v63  ;;  %v3293_v63 = vmov 0.0|0.0  }
  0x11   :  { %2807 = vmatpush1.bf16.msra.mxu0 %v2806_v39  ;;  %v82_v11 = vld [vmem:[%s4858_s1 + $0x120] sm:$0xff]  ;;  %v85_v12 = vld [vmem:[%s4858_s1 + $0x138] sm:$0xff]  ;;  %v92_v14 = vld [vmem:[%s4858_s1 + $0x170] sm:$0xff]  ;;  %v2894_v15 = vpack.c.bf16 %v75_v4, %v72_v3  ;;  %v2896_v16 = vpack.c.bf16 %v129_v9, %v126_v8 }
  0x12   :  { %2809 = vmatprep.subr.bf16.mxu0 %v2808_v44  ;;  %2887 = vmatpush3.bf16.msra.mxu1 %v2886_v50  ;;  %v89_v13 = vld [vmem:[%s4858_s1 + $0x158] sm:$0xff]  ;;  %v78_v17 = vld [vmem:[%s4858_s1 + $0x100] sm:$0xff]  ;;  %v2818_v20 = vpack.c.bf16 %v85_v12, %v82_v11  ;;  %v132_v21 = vld [vmem:[%s4858_s1 + $0x2b0] sm:$0xff] }
  0x13   :  { %2889 = vmatprep.subr.bf16.mxu1 %v2888_v51  ;;  %v81_v18 = vld [vmem:[%s4858_s1 + $0x118] sm:$0xff]  ;;  %v135_v22 = vld [vmem:[%s4858_s1 + $0x2c8] sm:$0xff]  ;;  %v2820_v23 = vpack.c.bf16 %v92_v14, %v89_v13  ;;  %v88_v24 = vld [vmem:[%s4858_s1 + $0x150] sm:$0xff] }
  0x14   :  { %v91_v25 = vld [vmem:[%s4858_s1 + $0x168] sm:$0xff]  ;;  %v98_v27 = vld [vmem:[%s4858_s1 + $0x1a0] sm:$0xff]  ;;  %v2898_v28 = vpack.c.bf16 %v81_v18, %v78_v17  ;;  %v2900_v30 = vpack.c.bf16 %v135_v22, %v132_v21  ;;  %v84_v31 = vld [vmem:[%s4858_s1 + $0x130] sm:$0xff] }
  0x15   :  { %2811 = vmatpush1.bf16.msra.mxu0 %v2810_v57  ;;  %v95_v26 = vld [vmem:[%s4858_s1 + $0x188] sm:$0xff]  ;;  %v3574_v29 = vld [vmem:[%s4857_s0] sm:$0x3f]  ;;  %v2822_v34 = vpack.c.bf16 %v91_v25, %v88_v24  ;;  %v141_v36 = vld [vmem:[%s4858_s1 + $0x2f8] sm:$0xff] }
  0x16   :  { %2813 = vmatprep.subr.bf16.mxu0 %v2812_v60  ;;  %2891 = vmatpush3.bf16.msra.mxu1 %v2890_v1  ;;  %v87_v32 = vld [vmem:[%s4858_s1 + $0x148] sm:$0xff]  ;;  %v3584_v33 = vrot.slane %v3574_v29, %v3551_v19  ;;  %v138_v35 = vld [vmem:[%s4858_s1 + $0x2e0] sm:$0xff]  ;;  %v2824_v37 = vpack.c.bf16 %v98_v27, %v95_v26  ;;  %v97_v39 = vld [vmem:[%s4858_s1 + $0x198] sm:$0xff] }
  0x17   :  { %2893 = vmatprep.subr.bf16.mxu1 %v2892_v2  ;;  %v94_v38 = vld [vmem:[%s4858_s1 + $0x180] sm:$0xff]  ;;  %v101_v41 = vld [vmem:[%s4858_s1 + $0x1b8] sm:$0xff]  ;;  %v104_v42 = vld [vmem:[%s4858_s1 + $0x1d0] sm:$0xff]  ;;  %v2902_v43 = vpack.c.bf16 %v87_v32, %v84_v31  ;;  %v2904_v44 = vpack.c.bf16 %v141_v36, %v138_v35 }
  0x18   :  { %v205_v40 = vcombine.high %v3584_v33, %v3584_v33  ;;  %v90_v45 = vld [vmem:[%s4858_s1 + $0x160] sm:$0xff]  ;;  %v93_v46 = vld [vmem:[%s4858_s1 + $0x178] sm:$0xff]  ;;  %v2826_v47 = vpack.c.bf16 %v97_v39, %v94_v38  ;;  %v2828_v48 = vpack.c.bf16 %v104_v42, %v101_v41  ;;  %v100_v49 = vld [vmem:[%s4858_s1 + $0x1b0] sm:$0xff] }
  0x19   :  { %2815 = vmatpush1.bf16.msra.mxu0 %v2814_v7  ;;  %v103_v50 = vld [vmem:[%s4858_s1 + $0x1c8] sm:$0xff]  ;;  %v110_v52 = vld [vmem:[%s4858_s1 + $0x200] sm:$0xff]  ;;  %v2906_v53 = vpack.c.bf16 %v93_v46, %v90_v45  ;;  %v144_v54 = vld [vmem:[%s4858_s1 + $0x310] sm:$0xff] }
  0x1a   :  { %2817 = vmatprep.subr.bf16.mxu0 %v2816_v10  ;;  %2895 = vmatpush3.bf16.msra.mxu1 %v2894_v15  ;;  %v107_v51 = vld [vmem:[%s4858_s1 + $0x1e8] sm:$0xff]  ;;  %v2830_v56 = vpack.c.bf16 %v103_v50, %v100_v49  ;;  %v106_v58 = vld [vmem:[%s4858_s1 + $0x1e0] sm:$0xff]  ;;  %v109_v59 = vld [vmem:[%s4858_s1 + $0x1f8] sm:$0xff]  ;;  %v3295_v10 = vmov 0.0  }
  0x1b   :  { %2897 = vmatprep.subr.bf16.mxu1 %v2896_v16  ;;  %417 = vmatprep.mubr.f32.mxu1 %v205_v40  ;;  %v147_v55 = vld [vmem:[%s4858_s1 + $0x328] sm:$0xff]  ;;  %v2832_v57 = vpack.c.bf16 %v110_v52, %v107_v51  ;;  %v113_v60 = vld [vmem:[%s4858_s1 + $0x218] sm:$0xff]  ;;  %v116_v61 = vld [vmem:[%s4858_s1 + $0x230] sm:$0xff]  ;;  %v2834_v2 = vpack.c.bf16 %v109_v59, %v106_v58 }
  0x1c   :  { %275 = vmatprep.mubr.f32.mxu0 %v205_v40  ;;  %v2909_v62 = vpack.c.bf16 %v147_v55, %v144_v54  ;;  %v150_v0 = vld [vmem:[%s4858_s1 + $0x340] sm:$0xff]  ;;  %v153_v1 = vld [vmem:[%s4858_s1 + $0x358] sm:$0xff]  ;;  %v2836_v3 = vpack.c.bf16 %v116_v61, %v113_v60  ;;  %v112_v4 = vld [vmem:[%s4858_s1 + $0x210] sm:$0xff] }
  0x1d   :  { %2819 = vmatpush1.bf16.msra.mxu0 %v2818_v20  ;;  %v115_v6 = vld [vmem:[%s4858_s1 + $0x228] sm:$0xff]  ;;  %v122_v8 = vld [vmem:[%s4858_s1 + $0x260] sm:$0xff]  ;;  %v2912_v9 = vpack.c.bf16 %v153_v1, %v150_v0 }
  0x1e   :  { %2821 = vmatprep.subr.bf16.mxu0 %v2820_v23  ;;  %2899 = vmatpush3.bf16.msra.mxu1 %v2898_v28  ;;  %v119_v7 = vld [vmem:[%s4858_s1 + $0x248] sm:$0xff] }
  0x1f   :  { %2901 = vmatprep.subr.bf16.mxu1 %v2900_v30 }
  0x21   :  { %2823 = vmatpush1.bf16.msra.mxu0 %v2822_v34 }
  0x22   :  { %2825 = vmatprep.subr.bf16.mxu0 %v2824_v37  ;;  %2903 = vmatpush3.bf16.msra.mxu1 %v2902_v43 }
  0x23   :  { %2905 = vmatprep.subr.bf16.mxu1 %v2904_v44 }
  0x25   :  { %2827 = vmatpush1.bf16.msra.mxu0 %v2826_v47 }
  0x26   :  { %2829 = vmatprep.subr.bf16.mxu0 %v2828_v48  ;;  %2907 = vmatpush3.bf16.msra.mxu1 %v2906_v53 }
  0x27   :  { %2908 = vmatprep.subr.bf16.mxu1 %v3293_v63 }
  0x29   :  { %2831 = vmatpush1.bf16.msra.mxu0 %v2830_v56  ;;  %418 = vmatmul.mubr.f32.vlgmr.msra.gmra.mrb[0].mxu1 %v3584_v33 }
  0x2a   :  { %2833 = vmatprep.subr.bf16.mxu0 %v2832_v57  ;;  %2910 = vmatpush3.bf16.msra.mxu1 %v2909_v62 }
  0x2b   :  { %2690 = vmatprep.mubr.msk.f32.mxu1 %vm3294_vm0, %v3295_v10 }
  0x2c   :  { %18 = vsyncpa [#allocation3], 0  ;;  %2911 = vmatprep.subr.bf16.mxu1 %v3293_v63  ;;  %v156_v11 = vld [vmem:[%s4858_s1 + $0x370] sm:$0xff]  ;;  %v159_v12 = vld [vmem:[%s4858_s1 + $0x388] sm:$0xff]  ;;  %v2838_v13 = vpack.c.bf16 %v115_v6, %v112_v4  ;;  %v2840_v14 = vpack.c.bf16 %v122_v8, %v119_v7  ;;  %v190_v35 = vcombine.high %v3574_v29, %v3574_v29  ;;  %vm208_vm1 = vcmask 654336   ;;  %s3299_s24 = smov 88  }
  0x2d   :  { %2835 = vmatpush1.bf16.msra.mxu0 %v2834_v2  ;;  %v118_v15 = vld [vmem:[%s4858_s1 + $0x240] sm:$0xff]  ;;  %v121_v16 = vld [vmem:[%s4858_s1 + $0x258] sm:$0xff]  ;;  %v128_v18 = vld [vmem:[%s4858_s1 + $0x290] sm:$0xff]  ;;  %v2915_v20 = vpack.c.bf16 %v159_v12, %v156_v11  ;;  %vm557_vm4 = vcmask 1043456   ;;  %vm3296_vm5 = vmmov 1   ;;  %vm553_vm8 = vcmask 359424  }
  0x2e   :  { %2837 = vmatprep.subr.bf16.mxu0 %v2836_v3  ;;  %v125_v17 = vld [vmem:[%s4858_s1 + $0x278] sm:$0xff]  ;;  %2913 = vmatpush3.bf16.msra.mxu1 %v2912_v9  ;;  %v162_v21 = vld [vmem:[%s4858_s1 + $0x3a0] sm:$0xff]  ;;  %v2842_v23 = vpack.c.bf16 %v121_v16, %v118_v15  ;;  %v124_v25 = vld [vmem:[%s4858_s1 + $0x270] sm:$0xff]  ;;  %v204_v42 = vrot.slane %v190_v35, %v3551_v19  ;;  %vm726_vm9 = vcmask 818176   ;;  %vm814_vm11 = vcmask 261120   ;;  %s3300_s25 = smov 65  }
  0x2f   :  { %2914 = vmatprep.subr.bf16.mxu1 %v3293_v63  ;;  %v165_v22 = vld [vmem:[%s4858_s1 + $0x3b8] sm:$0xff]  ;;  %v2844_v24 = vpack.c.bf16 %v128_v18, %v125_v17  ;;  %v127_v26 = vld [vmem:[%s4858_s1 + $0x288] sm:$0xff]  ;;  %v134_v28 = vld [vmem:[%s4858_s1 + $0x2c0] sm:$0xff]  ;;  %s3303_s26 = smov 46   ;;  %s3304_s27 = smov 2  }
  0x30   :  { %v131_v27 = vld [vmem:[%s4858_s1 + $0x2a8] sm:$0xff]  ;;  %v2918_v30 = vpack.c.bf16 %v165_v22, %v162_v21  ;;  %v168_v31 = vld [vmem:[%s4858_s1 + $0x3d0] sm:$0xff]  ;;  %v2846_v34 = vpack.c.bf16 %v127_v26, %v124_v25  ;;  %v130_v37 = vld [vmem:[%s4858_s1 + $0x2a0] sm:$0xff]  ;;  %s3306_s28 = smov 90   ;;  %s3307_s29 = smov 69  }
  0x31   :  { %2839 = vmatpush1.bf16.msra.mxu0 %v2838_v13  ;;  %v171_v32 = vld [vmem:[%s4858_s1 + $0x3e8] sm:$0xff]  ;;  %v2848_v36 = vpack.c.bf16 %v134_v28, %v131_v27  ;;  %v133_v38 = vld [vmem:[%s4858_s1 + $0x2b8] sm:$0xff]  ;;  %v140_v40 = vld [vmem:[%s4858_s1 + $0x2f0] sm:$0xff]  ;;  %s3308_s30 = smov 109   ;;  %s3309_s14 = smov 67  }
  0x32   :  { %2841 = vmatprep.subr.bf16.mxu0 %v2840_v14  ;;  %2916 = vmatpush3.bf16.msra.mxu1 %v2915_v20  ;;  %v137_v39 = vld [vmem:[%s4858_s1 + $0x2d8] sm:$0xff]  ;;  %v2921_v29 = vpack.c.bf16 %v171_v32, %v168_v31  ;;  %v2850_v41 = vpack.c.bf16 %v133_v38, %v130_v37  ;;  %v136_v44 = vld [vmem:[%s4858_s1 + $0x2d0] sm:$0xff]  ;;  %v139_v45 = vld [vmem:[%s4858_s1 + $0x2e8] sm:$0xff]  ;;  %s3310_s15 = smov 25   ;;  %s3311_s16 = smov 4  }
  0x33   :  { %2917 = vmatprep.subr.bf16.mxu1 %v3293_v63  ;;  %v2852_v43 = vpack.c.bf16 %v140_v40, %v137_v39  ;;  %v143_v46 = vld [vmem:[%s4858_s1 + $0x308] sm:$0xff]  ;;  %v146_v47 = vld [vmem:[%s4858_s1 + $0x320] sm:$0xff]  ;;  %v2854_v19 = vpack.c.bf16 %v139_v45, %v136_v44  ;;  %v145_v50 = vld [vmem:[%s4858_s1 + $0x318] sm:$0xff]  ;;  %s3313_s0 = smov [#allocation2]  }
  0x34   :  { %v2856_v48 = vpack.c.bf16 %v146_v47, %v143_v46  ;;  %v142_v49 = vld [vmem:[%s4858_s1 + $0x300] sm:$0xff]  ;;  %v149_v51 = vld [vmem:[%s4858_s1 + $0x338] sm:$0xff]  ;;  %v152_v52 = vld [vmem:[%s4858_s1 + $0x350] sm:$0xff] }
  0x35   :  { %2843 = vmatpush1.bf16.msra.mxu0 %v2842_v23  ;;  %v2858_v53 = vpack.c.bf16 %v145_v50, %v142_v49  ;;  %v2860_v54 = vpack.c.bf16 %v152_v52, %v149_v51  ;;  %v148_v55 = vld [vmem:[%s4858_s1 + $0x330] sm:$0xff]  ;;  %v151_v56 = vld [vmem:[%s4858_s1 + $0x348] sm:$0xff]  ;;  %v158_v58 = vld [vmem:[%s4858_s1 + $0x380] sm:$0xff] }
  0x36   :  { %2845 = vmatprep.subr.bf16.mxu0 %v2844_v24  ;;  %2919 = vmatpush3.bf16.msra.mxu1 %v2918_v30  ;;  %v155_v57 = vld [vmem:[%s4858_s1 + $0x368] sm:$0xff]  ;;  %v2862_v59 = vpack.c.bf16 %v151_v56, %v148_v55  ;;  %v154_v61 = vld [vmem:[%s4858_s1 + $0x360] sm:$0xff]  ;;  %v157_v62 = vld [vmem:[%s4858_s1 + $0x378] sm:$0xff] }
  0x37   :  { %2920 = vmatprep.subr.bf16.mxu1 %v3293_v63  ;;  %v2864_v60 = vpack.c.bf16 %v158_v58, %v155_v57  ;;  %v161_v0 = vld [vmem:[%s4858_s1 + $0x398] sm:$0xff]  ;;  %v2866_v1 = vpack.c.bf16 %v157_v62, %v154_v61  ;;  %v160_v3 = vld [vmem:[%s4858_s1 + $0x390] sm:$0xff]  ;;  %v163_v4 = vld [vmem:[%s4858_s1 + $0x3a8] sm:$0xff] }
  0x38   :  { %v167_v6 = vld [vmem:[%s4858_s1 + $0x3c8] sm:$0xff]  ;;  %v170_v7 = vld [vmem:[%s4858_s1 + $0x3e0] sm:$0xff]  ;;  %v2870_v8 = vpack.c.bf16 %v163_v4, %v160_v3  ;;  %v169_v12 = vld [vmem:[%s4858_s1 + $0x3d8] sm:$0xff] }
  0x39   :  { %2847 = vmatpush1.bf16.msra.mxu0 %v2846_v34  ;;  %v2872_v9 = vpack.c.bf16 %v170_v7, %v167_v6  ;;  %v166_v11 = vld [vmem:[%s4858_s1 + $0x3c0] sm:$0xff]  ;;  %v525_v15 = vld [vmem:[%s4860_s3 + $0x88] sm:$0xff]  ;;  %v526_v21 = vld [vmem:[%s4860_s3 + $0x90] sm:$0xff] }
  0x3a   :  { %2849 = vmatprep.subr.bf16.mxu0 %v2848_v36  ;;  %2922 = vmatpush3.bf16.msra.mxu1 %v2921_v29  ;;  %v2874_v13 = vpack.c.bf16 %v169_v12, %v166_v11  ;;  %v524_v14 = vld [vmem:[%s4860_s3 + $0x80] sm:$0xff]  ;;  %v509_v18 = vld [vmem:[%s4860_s3 + $0x8] sm:$0xff]  ;;  %v527_v22 = vld [vmem:[%s4860_s3 + $0x98] sm:$0xff]  ;;  %v3903_v11 = vsub.s32 0, %v3524_v5  ;;  %v3906_v12 = vsub.s32 1, %v3524_v5 }
  0x3b   :  { %v2923_v16 = vpack.c.bf16 %v525_v15, %v524_v14  ;;  %v508_v17 = vld [vmem:[%s4860_s3] sm:$0xff]  ;;  %v2927_v23 = vpack.c.bf16 %v527_v22, %v526_v21  ;;  %v510_v24 = vld [vmem:[%s4860_s3 + $0x10] sm:$0xff]  ;;  %v511_v25 = vld [vmem:[%s4860_s3 + $0x18] sm:$0xff] }
  0x3c   :  { %v2925_v20 = vpack.c.bf16 %v509_v18, %v508_v17  ;;  %v2929_v26 = vpack.c.bf16 %v511_v25, %v510_v24  ;;  %v528_v27 = vld [vmem:[%s4860_s3 + $0xa0] sm:$0xff]  ;;  %v529_v28 = vld [vmem:[%s4860_s3 + $0xa8] sm:$0xff]  ;;  %v530_v35 = vld [vmem:[%s4860_s3 + $0xb0] sm:$0xff] }
  0x3d   :  { %2851 = vmatpush1.bf16.msra.mxu0 %v2850_v41  ;;  %2691 = vmatmul.mubr.msk.f32.vlgmr.msra.gmra.mrb[2].mxu1 %vm208_vm1, %v204_v42  ;;  %v512_v30 = vld [vmem:[%s4860_s3 + $0x20] sm:$0xff]  ;;  %v2931_v31 = vpack.c.bf16 %v529_v28, %v528_v27  ;;  %v513_v32 = vld [vmem:[%s4860_s3 + $0x28] sm:$0xff]  ;;  %v531_v36 = vld [vmem:[%s4860_s3 + $0xb8] sm:$0xff] }
  0x3e   :  { %2853 = vmatprep.subr.bf16.mxu0 %v2852_v43  ;;  %2924 = vmatprep.subr.bf16.mxu1 %v2923_v16  ;;  %v2933_v34 = vpack.c.bf16 %v513_v32, %v512_v30  ;;  %v2935_v37 = vpack.c.bf16 %v531_v36, %v530_v35  ;;  %v514_v38 = vld [vmem:[%s4860_s3 + $0x30] sm:$0xff]  ;;  %v515_v39 = vld [vmem:[%s4860_s3 + $0x38] sm:$0xff]  ;;  %v532_v29 = vld [vmem:[%s4860_s3 + $0xc0] sm:$0xff] }
  0x3f   :  { %2926 = vmatpush3.bf16.msra.mxu1 %v2925_v20  ;;  %v2937_v40 = vpack.c.bf16 %v515_v39, %v514_v38  ;;  %v533_v41 = vld [vmem:[%s4860_s3 + $0xc8] sm:$0xff]  ;;  %v516_v43 = vld [vmem:[%s4860_s3 + $0x40] sm:$0xff]  ;;  %v534_v46 = vld [vmem:[%s4860_s3 + $0xd0] sm:$0xff] }
  0x40   :  { %2928 = vmatprep.subr.bf16.mxu1 %v2927_v23  ;;  %v517_v44 = vld [vmem:[%s4860_s3 + $0x48] sm:$0xff]  ;;  %v535_v47 = vld [vmem:[%s4860_s3 + $0xd8] sm:$0xff]  ;;  %v536_v50 = vld [vmem:[%s4860_s3 + $0xe0] sm:$0xff] }
  0x41   :  { %2855 = vmatpush1.bf16.msra.mxu0 %v2854_v19  ;;  %v2941_v45 = vpack.c.bf16 %v517_v44, %v516_v43  ;;  %v2943_v19 = vpack.c.bf16 %v535_v47, %v534_v46  ;;  %v519_v49 = vld [vmem:[%s4860_s3 + $0x58] sm:$0xff]  ;;  %v537_v52 = vld [vmem:[%s4860_s3 + $0xe8] sm:$0xff]  ;;  %v538_v56 = vld [vmem:[%s4860_s3 + $0xf0] sm:$0xff] }
  0x42   :  { %2857 = vmatprep.subr.bf16.mxu0 %v2856_v48  ;;  %v518_v48 = vld [vmem:[%s4860_s3 + $0x50] sm:$0xff]  ;;  %v2947_v55 = vpack.c.bf16 %v537_v52, %v536_v50  ;;  %v539_v57 = vld [vmem:[%s4860_s3 + $0xf8] sm:$0xff]  ;;  %v172_v3 = vld [vmem:[%s4859_s2] sm:$0x7]  ;;  %s3298_s2 = smov 86  }
  0x43   :  { %2930 = vmatpush3.bf16.msra.mxu1 %v2929_v26  ;;  %v2945_v51 = vpack.c.bf16 %v519_v49, %v518_v48  ;;  %v523_v61 = vld [vmem:[%s4860_s3 + $0x78] sm:$0xff]  ;;  %v181_v14 = vrot.slane %v172_v3, %v3906_v12  ;;  %v540_v24 = vld [vmem:[%s4860_s3 + $0x100] sm:$0xff]  ;;  %v541_v25 = vld [vmem:[%s4860_s3 + $0x108] sm:$0xff] }
  0x44   :  { %276 = vmatmul.mubr.f32.vlgmr.msra.gmra.mrb[0].mxu0 %v3584_v33  ;;  %v164_v33 = vld [vmem:[%s4858_s1 + $0x3b0] sm:$0xff]  ;;  %2932 = vmatprep.subr.bf16.mxu1 %v2931_v31  ;;  %v2956_v30 = vpack.c.bf16 %v541_v25, %v540_v24  ;;  %v545_v38 = vld [vmem:[%s4860_s3 + $0x128] sm:$0xf]  ;;  %vm3933_vm6 = vmpackc.low %vm557_vm4, %vm3296_vm5  ;;  %vm2298_vm5 = vcmask 304264  }
  0x45   :  { %2859 = vmatpush1.bf16.msra.mxu0 %v2858_v53  ;;  %346 = vmatprep.mubr.f32.mxu0 %v3295_v10  ;;  %v2868_v2 = vpack.c.bf16 %v164_v33, %v161_v0  ;;  %v520_v53 = vld [vmem:[%s4860_s3 + $0x60] sm:$0xff]  ;;  %v542_v32 = vld [vmem:[%s4860_s3 + $0x110] sm:$0xff]  ;;  %v707_v44 = vld [vmem:[%s4862_s5 + $0x8] sm:$0xff] }
  0x46   :  { %2861 = vmatprep.subr.bf16.mxu0 %v2860_v54  ;;  %v521_v54 = vld [vmem:[%s4860_s3 + $0x68] sm:$0xff]  ;;  %v706_v43 = vld [vmem:[%s4862_s5] sm:$0xff]  ;;  %v709_v47 = vld [vmem:[%s4862_s5 + $0x18] sm:$0xff] }
  0x47   :  { %2934 = vmatpush3.bf16.msra.mxu1 %v2933_v34  ;;  %v2949_v58 = vpack.c.bf16 %v521_v54, %v520_v53  ;;  %v543_v34 = vld [vmem:[%s4860_s3 + $0x118] sm:$0xff]  ;;  %v2966_v46 = vpack.c.bf16 %v707_v44, %v706_v43  ;;  %v710_v48 = vld [vmem:[%s4862_s5 + $0x20] sm:$0xff]  ;;  %v711_v49 = vld [vmem:[%s4862_s5 + $0x28] sm:$0xff] }
  0x48   :  { %2936 = vmatprep.subr.bf16.mxu1 %v2935_v37  ;;  %v2959_v36 = vpack.c.bf16 %v543_v34, %v542_v32  ;;  %v544_v37 = vld [vmem:[%s4860_s3 + $0x120] sm:$0xff]  ;;  %v2972_v50 = vpack.c.bf16 %v711_v49, %v710_v48  ;;  %v713_v52 = vld [vmem:[%s4862_s5 + $0x38] sm:$0xff]  ;;  %v895_v24 = vld [vmem:[%s4866_s9 + $0x10] sm:$0xff] }
  0x49   :  { %2863 = vmatpush1.bf16.msra.mxu0 %v2862_v59  ;;  %v2951_v59 = vpack.c.bf16 %v539_v57, %v538_v56  ;;  %v714_v54 = vld [vmem:[%s4862_s5 + $0x40] sm:$0xff]  ;;  %v716_v57 = vld [vmem:[%s4862_s5 + $0x50] sm:$0xff]  ;;  %v898_v25 = vld [vmem:[%s4866_s9 + $0x28] sm:$0xff] }
  0x4a   :  { %2865 = vmatprep.subr.bf16.mxu0 %v2864_v60  ;;  %v522_v60 = vld [vmem:[%s4860_s3 + $0x70] sm:$0xff]  ;;  %v896_v32 = vld [vmem:[%s4866_s9 + $0x18] sm:$0xff]  ;;  %v2488_v34 = vld [vmem:[%s4863_s6] ss:$0 sm:$0xff]  ;;  %s3305_s6 = smov 111  }
  0x4b   :  { %2938 = vmatpush3.bf16.msra.mxu1 %v2937_v40  ;;  %v2953_v62 = vpack.c.bf16 %v523_v61, %v522_v60  ;;  %v2962_v40 = vpack.c.bf16 %v545_v38, %v544_v37  ;;  %v718_v60 = vld [vmem:[%s4862_s5 + $0x60] sm:$0xf]  ;;  %v902_v43 = vld [vmem:[%s4866_s9 + $0x48] sm:$0xff]  ;;  %v908_v48 = vld [vmem:[%s4866_s9 + $0x78] sm:$0xff] }
  0x4c   :  { %v803_v61 = vld [vmem:[%s4864_s7] sm:$0xff]  ;;  %v907_v49 = vld [vmem:[%s4866_s9 + $0x70] sm:$0xff] }
  0x4d   :  { %2867 = vmatpush1.bf16.msra.mxu0 %v2866_v1 }
  0x4e   :  { %2869 = vmatprep.subr.bf16.mxu0 %v2868_v2  ;;  %v3896_v2 = vsub.s32 2, %v3524_v5 }
  0x50   :  { %v185_v4 = vrot.slane %v172_v3, %v3896_v2 }
  0x51   :  { %2871 = vmatpush1.bf16.msra.mxu0 %v2870_v8 }
  0x52   :  { %2873 = vmatprep.subr.bf16.mxu0 %v2872_v9 }
  0x55   :  { %2875 = vmatpush1.bf16.msra.mxu0 %v2874_v13  ;;  %v177_v13 = vrot.slane %v172_v3, %v3903_v11 }
  0x56   :  { %2983 = vmatprep.subr.bf16.mxu0 %v3293_v63 }
  0x58   :  { %2479 = vmatmul.mubr.msk.f32.vlgmr.msra.gmra.mrb[0].mxu0 %vm208_vm1, %v204_v42  ;;  %v2939_v42 = vpack.c.bf16 %v533_v41, %v532_v29  ;;  %vm1542_vm1 = vcmask 164864  }
  0x59   :  { %2745 = vmatprep.mubr.msk.f32.mxu0 %vm3294_vm0, %v3295_v10 }
  0x5a   :  { %2940 = vmatprep.subr.bf16.mxu1 %v2939_v42 }
  0x5b   :  { %2942 = vmatpush3.bf16.msra.mxu1 %v2941_v45  ;;  %v708_v45 = vld [vmem:[%s4862_s5 + $0x10] sm:$0xff] }
  0x5c   :  { %2944 = vmatprep.subr.bf16.mxu1 %v2943_v19  ;;  %v2969_v19 = vpack.c.bf16 %v709_v47, %v708_v45  ;;  %v906_v45 = vld [vmem:[%s4866_s9 + $0x68] sm:$0xff] }
  0x5f   :  { %2946 = vmatpush3.bf16.msra.mxu1 %v2945_v51  ;;  %v712_v51 = vld [vmem:[%s4862_s5 + $0x30] sm:$0xff] }
  0x60   :  { %2948 = vmatprep.subr.bf16.mxu1 %v2947_v55  ;;  %v2975_v53 = vpack.c.bf16 %v713_v52, %v712_v51  ;;  %v715_v55 = vld [vmem:[%s4862_s5 + $0x48] sm:$0xff] }
  0x61   :  { %v2978_v56 = vpack.c.bf16 %v715_v55, %v714_v54  ;;  %v910_v51 = vld [vmem:[%s4866_s9 + $0x88] sm:$0xff]  ;;  %v915_v54 = vld [vmem:[%s4866_s9 + $0xb0] sm:$0xff] }
  0x62   :  { %v3020_v52 = vpack.c.bf16 %v910_v51, %v907_v49  ;;  %v1126_v49 = vld [vmem:[%s4868_s11 + $0x48] sm:$0xff] }
  0x63   :  { %2950 = vmatpush3.bf16.msra.mxu1 %v2949_v58  ;;  %v717_v58 = vld [vmem:[%s4862_s5 + $0x58] sm:$0xff] }
  0x64   :  { %2952 = vmatprep.subr.bf16.mxu1 %v2951_v59  ;;  %v2981_v59 = vpack.c.bf16 %v717_v58, %v716_v57  ;;  %v914_v57 = vld [vmem:[%s4866_s9 + $0xa8] sm:$0xff]  ;;  %v913_v58 = vld [vmem:[%s4866_s9 + $0xa0] sm:$0xff] }
  0x67   :  { %2954 = vmatpush3.bf16.msra.mxu1 %v2953_v62  ;;  %v804_v62 = vld [vmem:[%s4864_s7 + $0x8] sm:$0xff] }
  0x68   :  { %2955 = vmatprep.subr.bf16.mxu1 %v3293_v63 }
  0xfc   :  { %v2539_v0 = vpop.f32.mrb[0].mxu1 }
  0xfd   :  { %v2540_v33 = vpop.f32.mrb[1].mxu1 }
  0xfe   :  { %v2541_v1 = vadd.f32 %v2540_v33, %v2539_v0  ;;  %v2984_v0 = vpack.c.bf16 %v804_v62, %v803_v61  ;;  %v918_v62 = vld [vmem:[%s4866_s9 + $0xc8] sm:$0xff] }
 0x100   :  { %v420_v6 = vadd.f32 %v2541_v1, %v185_v4  ;;  %2985 = vmatpush3.bf16.msra.mxu0 %v2984_v0  ;;  %v2484_v4 = vld [vmem:[%s4861_s4] ss:$0 sm:$0xff]  ;;  %s3302_s4 = smov 23  }
 0x101   :  { %2986 = vmatprep.subr.bf16.mxu0 %v3293_v63  ;;  %v921_v0 = vld [vmem:[%s4866_s9 + $0xe0] sm:$0xff] }
 0x110   :  { %v489_v7 = vpop.f32.mrb[2].mxu1 }
 0x111   :  { %v490_v8 = vadd.f32 %v489_v7, %v420_v6  ;;  %v2692_v9 = vpop.f32.mrb[3].mxu1 }
 0x113   :  { %v500_v22 = vmul.f32 1.442695, %v490_v8  ;;  %vm495_vm7 = vcmp.gt.f32.partialorder %v490_v8, 0.0 }
 0x12b   :  { %v348_v15 = vpop.f32.mrb[0].mxu0 }
 0x12c   :  { %v3151_v16 = vadd.f32 %v348_v15, %v177_v13  ;;  %v350_v17 = vpop.f32.mrb[1].mxu0 }
 0x12d   :  { %v3152_v18 = vadd.f32 %v350_v17, %v181_v14  ;;  %v805_v17 = vld [vmem:[%s4864_s7 + $0x10] sm:$0xff] }
 0x12e   :  { %v496_v20 = vmul.f32 1.442695, %v3151_v16  ;;  %vm493_vm3 = vcmp.gt.f32.partialorder %v3151_v16, 0.0 }
 0x12f   :  { %v498_v21 = vmul.f32 1.442695, %v3152_v18  ;;  %vm494_vm2 = vcmp.gt.f32.partialorder %v3152_v18, 0.0 }
 0x130   :  { %3184 = vpow2.f32 %v496_v20 }
 0x131   :  { %3186 = vpow2.f32 %v498_v21  ;;  %v894_v21 = vld [vmem:[%s4866_s9 + $0x8] sm:$0xff] }
 0x132   :  { %3188 = vpow2.f32 %v500_v22  ;;  %v897_v22 = vld [vmem:[%s4866_s9 + $0x20] sm:$0xff] }
 0x13a   :  { %v3185_v23 = vpop.eup %3184 }
 0x13b   :  { %v3187_v26 = vpop.eup %3186  ;;  %v2481_v27 = vadd.f32 -1.0, %v3185_v23  ;;  %v2989_v23 = vpack.c.bf16 %v897_v22, %v894_v21  ;;  %v930_v22 = vld [vmem:[%s4866_s9 + $0x128] sm:$0xf] }
 0x13c   :  { %v2482_v28 = vadd.f32 -1.0, %v3187_v26  ;;  %v3189_v39 = vpop.eup %3188  ;;  %v3014_v26 = vpack.c.bf16 %v898_v25, %v895_v24  ;;  %v931_v24 = vld [vmem:[%s4866_s9 + $0x130] sm:$0xf]  ;;  %v1118_v25 = vld [vmem:[%s4868_s11 + $0x8] sm:$0xff] }
 0x13d   :  { %v505_v35 = vsel %vm493_vm3, %v3151_v16, %v2481_v27  ;;  %v2483_v41 = vadd.f32 -1.0, %v3189_v39  ;;  %v901_v27 = vld [vmem:[%s4866_s9 + $0x40] sm:$0xff]  ;;  %vm1995_vm3 = vcmask 492864  }
 0x13e   :  { %v506_v31 = vsel %vm494_vm2, %v3152_v18, %v2482_v28  ;;  %v806_v18 = vld [vmem:[%s4864_s7 + $0x18] sm:$0xff]  ;;  %vm1637_vm2 = vcmask 509264   ;;  %s2468_s7 = sshll.u32 %s3313_s0, 4  ;;  %s2469_s7 = int_to_ptr.vmem [resolvable:$true] %s2468_s7 }
 0x13f   :  { %625 = vmatprep.mubr.f32.mxu1 %v506_v31  ;;  %v507_v42 = vsel %vm495_vm7, %v490_v8, %v2483_v41  ;;  %v2987_v20 = vpack.c.bf16 %v806_v18, %v805_v17  ;;  %v904_v28 = vld [vmem:[%s4866_s9 + $0x58] sm:$0xff]  ;;  %v893_v31 = vld [vmem:[%s4866_s9] sm:$0xff]  ;;  %vm2353_vm7 = vcmask 476464   ;;  %s3268_s3 = scalar_lea.vmem %s2469_s7, 512  ;;  %p3273_p1 = scmp.lt.s32.totalorder %s2469_s7, %s2469_s7 }
 0x140   :  { %626 = vmatmul.mubr.f32.vlgmr.msra.gmra.mrb[4].mxu1 %v505_v35  ;;  %v900_v35 = vld [vmem:[%s4866_s9 + $0x38] sm:$0xff]  ;;  %v2991_v38 = vpack.c.bf16 %v896_v32, %v893_v31  ;;  %v925_v17 = vld [vmem:[%s4866_s9 + $0x100] sm:$0xff]  ;;  %p3269_p0 = scmp.ne.s32.totalorder %s2469_s7, %s3268_s3  ;;  %p3274_p2 = scmp.lt.s32.totalorder %s3268_s3, %s3268_s3 }
 0x141   :  { %2957 = vmatpush3.bf16.msra.mxu1 %v2956_v30  ;;  %2705 = vmatprep.mubr.msk.f32.mxu1 %vm3294_vm0, %v3295_v10  ;;  %v3017_v30 = vpack.c.bf16 %v904_v28, %v901_v27  ;;  %v1167_v28 = vld [vmem:[%s4868_s11 + $0x190] sm:$0xff]  ;;  %v2491_v32 = vld [vmem:[%s4865_s8] ss:$0 sm:$0xff]  ;;  %s3301_s8 = smov 44  }
 0x142   :  { %2958 = vmatprep.subr.bf16.mxu1 %v3293_v63  ;;  %2988 = vmatpush3.bf16.msra.mxu0 %v2987_v20  ;;  %v928_v20 = vld [vmem:[%s4866_s9 + $0x118] sm:$0xff]  ;;  %p3275_p3 = por %p3274_p2, %p3273_p1 }
 0x143   :  { %2990 = vmatprep.subr.bf16.mxu0 %v2989_v23  ;;  %v3029_v21 = vpack.c.bf16 %v928_v20, %v925_v17  ;;  %v929_v23 = vld [vmem:[%s4866_s9 + $0x120] sm:$0xf] }
 0x144   :  { %v1145_v17 = vld [vmem:[%s4868_s11 + $0xe0] sm:$0xff]  ;;  %p3276_p4 = pnand %p3275_p3, %p3269_p0 }
 0x145   :  { %2960 = vmatpush3.bf16.msra.mxu1 %v2959_v36  ;;  %v903_v36 = vld [vmem:[%s4866_s9 + $0x50] sm:$0xff] }
 0x146   :  { %2961 = vmatprep.subr.bf16.mxu1 %v3293_v63  ;;  %v2993_v41 = vpack.c.bf16 %v903_v36, %v900_v35 }
 0x149   :  { %2964 = vmatpush3.bf16.msk.msra.mxu1 %vm3933_vm6, %v2962_v40 }
 0x14a   :  { %2965 = vmatprep.subr.bf16.mxu1 %v3293_v63 }
 0x14c   :  { %2706 = vmatmul.mubr.msk.f32.vlgmr.msra.gmra.mrb[6].mxu1 %vm553_vm8, %v507_v42  ;;  %v899_v42 = vld [vmem:[%s4866_s9 + $0x30] sm:$0xff] }
 0x14d   :  { %2734 = vmatprep.mubr.msk.f32.mxu1 %vm3294_vm0, %v3295_v10  ;;  %2967 = vmatpush3.bf16.msra.mxu1 %v2966_v46  ;;  %v2995_v44 = vpack.c.bf16 %v902_v43, %v899_v42  ;;  %v909_v46 = vld [vmem:[%s4866_s9 + $0x80] sm:$0xff]  ;;  %v1122_v42 = vld [vmem:[%s4868_s11 + $0x28] sm:$0xff]  ;;  %v1127_v43 = vld [vmem:[%s4868_s11 + $0x50] sm:$0xff] }
 0x14e   :  { %2968 = vmatprep.subr.bf16.mxu1 %v3293_v63  ;;  %v2997_v47 = vpack.c.bf16 %v909_v46, %v906_v45  ;;  %v1176_v45 = vld [vmem:[%s4868_s11 + $0x1d8] sm:$0xff] }
 0x151   :  { %2970 = vmatpush3.bf16.msra.mxu1 %v2969_v19  ;;  %v905_v19 = vld [vmem:[%s4866_s9 + $0x60] sm:$0xff] }
 0x152   :  { %2971 = vmatprep.subr.bf16.mxu1 %v3293_v63 }
 0x155   :  { %2973 = vmatpush3.bf16.msra.mxu1 %v2972_v50  ;;  %v2999_v50 = vpack.c.bf16 %v908_v48, %v905_v19  ;;  %v1123_v48 = vld [vmem:[%s4868_s11 + $0x30] sm:$0xff] }
 0x156   :  { %2974 = vmatprep.subr.bf16.mxu1 %v3293_v63 }
 0x159   :  { %2976 = vmatpush3.bf16.msra.mxu1 %v2975_v53  ;;  %v912_v53 = vld [vmem:[%s4866_s9 + $0x98] sm:$0xff] }
 0x15a   :  { %2977 = vmatprep.subr.bf16.mxu1 %v3293_v63  ;;  %v3001_v55 = vpack.c.bf16 %v915_v54, %v912_v53  ;;  %v1125_v54 = vld [vmem:[%s4868_s11 + $0x40] sm:$0xff] }
 0x15d   :  { %2979 = vmatpush3.bf16.msra.mxu1 %v2978_v56  ;;  %v911_v56 = vld [vmem:[%s4866_s9 + $0x90] sm:$0xff] }
 0x15e   :  { %2980 = vmatprep.subr.bf16.mxu1 %v3293_v63 }
 0x161   :  { %2982 = vmatpush3.bf16.msra.mxu1 %v2981_v59  ;;  %v3003_v59 = vpack.c.bf16 %v914_v57, %v911_v56  ;;  %v1133_v57 = vld [vmem:[%s4868_s11 + $0x80] sm:$0xff] }
 0x162   :  { %2732 = vmatprep.subr.mxu1 %v3295_v10 }
 0x165   :  { %2733 = vmatpush3.msk.msra.mxu1 %vm557_vm4, %v718_v60  ;;  %v916_v60 = vld [vmem:[%s4866_s9 + $0xb8] sm:$0xff] }
 0x166   :  { %3013 = vmatprep.subr.bf16.mxu1 %v3293_v63  ;;  %v3023_v61 = vpack.c.bf16 %v916_v60, %v913_v58  ;;  %v1179_v58 = vld [vmem:[%s4868_s11 + $0x1f0] sm:$0xff]  ;;  %v3037_v60 = vpack.c.bf16 %v1126_v49, %v1123_v48  ;;  %v1172_v48 = vld [vmem:[%s4868_s11 + $0x1b8] sm:$0xff] }
 0x167   :  { %v1175_v49 = vld [vmem:[%s4868_s11 + $0x1d0] sm:$0xff] }
 0x213   :  { %v2585_v33 = vpop.f32.mrb[4].mxu1 }
 0x214   :  { %v2586_v1 = vpop.f32.mrb[5].mxu1 }
 0x215   :  { %v2587_v3 = vadd.f32 %v2586_v1, %v2585_v33  ;;  %v3005_v33 = vpack.c.bf16 %v921_v0, %v918_v62  ;;  %v917_v1 = vld [vmem:[%s4866_s9 + $0xc0] sm:$0xff] }
 0x217   :  { %v628_v6 = vadd.f32 %v2587_v3, %v2484_v4  ;;  %v920_v3 = vld [vmem:[%s4866_s9 + $0xd8] sm:$0xff]  ;;  %v919_v4 = vld [vmem:[%s4866_s9 + $0xd0] sm:$0xff] }
 0x21f   :  { %v697_v7 = vpop.f32.mrb[6].mxu1 }
 0x220   :  { %v698_v8 = vadd.f32 %v697_v7, %v628_v6  ;;  %v2707_v9 = vpop.f32.mrb[7].mxu1  ;;  %v3007_v6 = vpack.c.bf16 %v920_v3, %v917_v1  ;;  %v922_v7 = vld [vmem:[%s4866_s9 + $0xe8] sm:$0xff]  ;;  %v1131_v3 = vld [vmem:[%s4868_s11 + $0x70] sm:$0xff] }
 0x221   :  { %v924_v9 = vld [vmem:[%s4866_s9 + $0xf8] sm:$0xff] }
 0x222   :  { %v702_v13 = vmul.f32 1.442695, %v698_v8  ;;  %vm701_vm10 = vcmp.gt.f32.partialorder %v698_v8, 0.0 }
 0x224   :  { %3190 = vpow2.f32 %v702_v13  ;;  %v927_v13 = vld [vmem:[%s4866_s9 + $0x110] sm:$0xff] }
 0x22e   :  { %v3191_v14 = vpop.eup %3190 }
 0x22f   :  { %v2487_v15 = vadd.f32 -1.0, %v3191_v14  ;;  %v3009_v14 = vpack.c.bf16 %v927_v13, %v924_v9 }
 0x231   :  { %v705_v16 = vsel %vm701_vm10, %v698_v8, %v2487_v15  ;;  %v3026_v8 = vpack.c.bf16 %v922_v7, %v919_v4  ;;  %v923_v15 = vld [vmem:[%s4866_s9 + $0xf0] sm:$0xff]  ;;  %v1134_v4 = vld [vmem:[%s4868_s11 + $0x88] sm:$0xff]  ;;  %vm1940_vm10 = vcmask 320664  }
 0x232   :  { %2735 = vmatmul.mubr.msk.f32.vlgmr.msra.gmra.mrb[8].mxu1 %vm726_vm9, %v705_v16  ;;  %v926_v16 = vld [vmem:[%s4866_s9 + $0x108] sm:$0xff]  ;;  %v1139_v7 = vld [vmem:[%s4868_s11 + $0xb0] sm:$0xff]  ;;  %v3119_v9 = vpack.c.bf16 %v1134_v4, %v1131_v3 }
 0x233   :  { %2774 = vmatprep.mubr.msk.f32.mxu1 %vm3294_vm0, %v3295_v10  ;;  %3015 = vmatpush3.bf16.msra.mxu1 %v3014_v26  ;;  %v3011_v18 = vpack.c.bf16 %v926_v16, %v923_v15  ;;  %v1121_v26 = vld [vmem:[%s4868_s11 + $0x20] sm:$0xff]  ;;  %v1138_v15 = vld [vmem:[%s4868_s11 + $0xa8] sm:$0xff]  ;;  %v1183_v3 = vld [vmem:[%s4868_s11 + $0x210] sm:$0xff] }
 0x234   :  { %3016 = vmatprep.subr.bf16.mxu1 %v3293_v63  ;;  %v3031_v27 = vpack.c.bf16 %v1121_v26, %v1118_v25  ;;  %v1142_v16 = vld [vmem:[%s4868_s11 + $0xc8] sm:$0xff] }
 0x235   :  { %v3047_v20 = vpack.c.bf16 %v1145_v17, %v1142_v16  ;;  %v1186_v4 = vld [vmem:[%s4868_s11 + $0x228] sm:$0xff]  ;;  %v1191_v16 = vld [vmem:[%s4868_s11 + $0x250] sm:$0xff] }
 0x237   :  { %3018 = vmatpush3.bf16.msra.mxu1 %v3017_v30  ;;  %v1170_v30 = vld [vmem:[%s4868_s11 + $0x1a8] sm:$0xff] }
 0x238   :  { %3019 = vmatprep.subr.bf16.mxu1 %v3293_v63  ;;  %v3109_v31 = vpack.c.bf16 %v1170_v30, %v1167_v28  ;;  %v1150_v28 = vld [vmem:[%s4868_s11 + $0x108] sm:$0xff] }
 0x239   :  { %v1154_v30 = vld [vmem:[%s4868_s11 + $0x128] sm:$0xff] }
 0x23b   :  { %3021 = vmatpush3.bf16.msra.mxu1 %v3020_v52  ;;  %v1130_v52 = vld [vmem:[%s4868_s11 + $0x68] sm:$0xff] }
 0x23c   :  { %3022 = vmatprep.subr.bf16.mxu1 %v3293_v63  ;;  %v3039_v0 = vpack.c.bf16 %v1133_v57, %v1130_v52  ;;  %v1171_v52 = vld [vmem:[%s4868_s11 + $0x1b0] sm:$0xff] }
 0x23f   :  { %3024 = vmatpush3.bf16.msra.mxu1 %v3023_v61  ;;  %v1129_v61 = vld [vmem:[%s4868_s11 + $0x60] sm:$0xff] }
 0x240   :  { %3025 = vmatprep.subr.bf16.mxu1 %v3293_v63 }
 0x243   :  { %3027 = vmatpush3.bf16.msra.mxu1 %v3026_v8 }
 0x244   :  { %3028 = vmatprep.subr.bf16.mxu1 %v3293_v63 }
 0x247   :  { %3030 = vmatpush3.bf16.msra.mxu1 %v3029_v21  ;;  %v1141_v21 = vld [vmem:[%s4868_s11 + $0xc0] sm:$0xff] }
 0x248   :  { %2772 = vmatprep.subr.mxu1 %v3295_v10 }
 0x24b   :  { %2773 = vmatpush3.msk.msra.mxu1 %vm557_vm4, %v931_v24  ;;  %v1151_v24 = vld [vmem:[%s4868_s11 + $0x110] sm:$0xff] }
 0x24c   :  { %3110 = vmatprep.subr.bf16.mxu1 %v3109_v31  ;;  %v1157_v31 = vld [vmem:[%s4868_s11 + $0x140] sm:$0xff] }
 0x305   :  { %v799_v37 = vpop.f32.mrb[8].mxu1 }
 0x306   :  { %v800_v39 = vadd.f32 %v2488_v34, %v799_v37  ;;  %v2736_v40 = vpop.f32.mrb[9].mxu1 }
 0x307   :  { %v1124_v40 = vld [vmem:[%s4868_s11 + $0x38] sm:$0xff] }
 0x308   :  { %2746 = vmatmul.mubr.msk.f32.vlgmr.msra.gmra.mrb[2].mxu0 %vm814_vm11, %v800_v39  ;;  %v1120_v39 = vld [vmem:[%s4868_s11 + $0x18] sm:$0xff]  ;;  %v3035_v51 = vpack.c.bf16 %v1127_v43, %v1124_v40  ;;  %v1166_v43 = vld [vmem:[%s4868_s11 + $0x188] sm:$0xff]  ;;  %vm2105_vm11 = vcmask 837264  }
 0x309   :  { %2992 = vmatpush1.bf16.msra.mxu0 %v2991_v38  ;;  %1025 = vmatprep.mubr.f32.mxu0 %v3295_v10  ;;  %v1117_v38 = vld [vmem:[%s4868_s11] sm:$0xff] }
 0x30a   :  { %2994 = vmatprep.subr.bf16.mxu0 %v2993_v41  ;;  %v1119_v41 = vld [vmem:[%s4868_s11 + $0x10] sm:$0xff]  ;;  %v3033_v19 = vpack.c.bf16 %v1120_v39, %v1117_v38 }
 0x30b   :  { %v1163_v38 = vld [vmem:[%s4868_s11 + $0x170] sm:$0xff] }
 0x30d   :  { %2996 = vmatpush1.bf16.msra.mxu0 %v2995_v44  ;;  %v1173_v44 = vld [vmem:[%s4868_s11 + $0x1c0] sm:$0xff] }
 0x30e   :  { %2998 = vmatprep.subr.bf16.mxu0 %v2997_v47  ;;  %v3113_v53 = vpack.c.bf16 %v1176_v45, %v1173_v44  ;;  %v1169_v44 = vld [vmem:[%s4868_s11 + $0x1a0] sm:$0xff] }
 0x311   :  { %3000 = vmatpush1.bf16.msra.mxu0 %v2999_v50  ;;  %v3111_v50 = vpack.c.bf16 %v1122_v42, %v1119_v41  ;;  %v1159_v41 = vld [vmem:[%s4868_s11 + $0x150] sm:$0xff]  ;;  %v1162_v42 = vld [vmem:[%s4868_s11 + $0x168] sm:$0xff] }
 0x312   :  { %3002 = vmatprep.subr.bf16.mxu0 %v3001_v55  ;;  %v1128_v55 = vld [vmem:[%s4868_s11 + $0x58] sm:$0xff]  ;;  %v3061_v45 = vpack.c.bf16 %v1162_v42, %v1159_v41  ;;  %v1202_v41 = vld [vmem:[%s4868_s11 + $0x2a8] sm:$0xff]  ;;  %v1205_v42 = vld [vmem:[%s4868_s11 + $0x2c0] sm:$0xff] }
 0x313   :  { %v3115_v62 = vpack.c.bf16 %v1128_v55, %v1125_v54  ;;  %v1178_v54 = vld [vmem:[%s4868_s11 + $0x1e8] sm:$0xff]  ;;  %v1181_v55 = vld [vmem:[%s4868_s11 + $0x200] sm:$0xff] }
 0x314   :  { %v3071_v57 = vpack.c.bf16 %v1181_v55, %v1178_v54  ;;  %v1209_v54 = vld [vmem:[%s4868_s11 + $0x2e0] sm:$0xff] }
 0x315   :  { %3004 = vmatpush1.bf16.msra.mxu0 %v3003_v59  ;;  %v1182_v59 = vld [vmem:[%s4868_s11 + $0x208] sm:$0xff] }
 0x316   :  { %3006 = vmatprep.subr.bf16.mxu0 %v3005_v33  ;;  %v1132_v33 = vld [vmem:[%s4868_s11 + $0x78] sm:$0xff]  ;;  %v3117_v1 = vpack.c.bf16 %v1182_v59, %v1179_v58  ;;  %v1177_v58 = vld [vmem:[%s4868_s11 + $0x1e0] sm:$0xff] }
 0x317   :  { %v3041_v8 = vpack.c.bf16 %v1132_v33, %v1129_v61  ;;  %v1180_v59 = vld [vmem:[%s4868_s11 + $0x1f8] sm:$0xff] }
 0x318   :  { %v1184_v61 = vld [vmem:[%s4868_s11 + $0x218] sm:$0xff] }
 0x319   :  { %3008 = vmatpush1.bf16.msra.mxu0 %v3007_v6  ;;  %v1136_v6 = vld [vmem:[%s4868_s11 + $0x98] sm:$0xff] }
 0x31a   :  { %3010 = vmatprep.subr.bf16.mxu0 %v3009_v14  ;;  %v3043_v13 = vpack.c.bf16 %v1139_v7, %v1136_v6  ;;  %v1135_v14 = vld [vmem:[%s4868_s11 + $0x90] sm:$0xff]  ;;  %v3077_v7 = vpack.c.bf16 %v1186_v4, %v1183_v3  ;;  %v932_v4 = vld [vmem:[%s4867_s10] sm:$0x7] }
 0x31d   :  { %3012 = vmatpush1.bf16.msra.mxu0 %v3011_v18  ;;  %v3045_v18 = vpack.c.bf16 %v1138_v15, %v1135_v14  ;;  %v1190_v14 = vld [vmem:[%s4868_s11 + $0x248] sm:$0xff]  ;;  %v1193_v15 = vld [vmem:[%s4868_s11 + $0x260] sm:$0xff] }
 0x31e   :  { %2494 = vmatprep.subr.msk.mxu0 %vm557_vm4, %v930_v22  ;;  %v1144_v22 = vld [vmem:[%s4868_s11 + $0xd8] sm:$0xff]  ;;  %v3079_v17 = vpack.c.bf16 %v1193_v15, %v1190_v14 }
 0x31f   :  { %v3049_v25 = vpack.c.bf16 %v1144_v22, %v1141_v21  ;;  %v1192_v21 = vld [vmem:[%s4868_s11 + $0x258] sm:$0xff] }
 0x321   :  { %2495 = vmatpush1.msk.msra.mxu0 %vm557_vm4, %v929_v23  ;;  %v1148_v23 = vld [vmem:[%s4868_s11 + $0xf8] sm:$0xff]  ;;  %vm1692_vm4 = vcmask 681464  }
 0x322   :  { %3032 = vmatprep.subr.bf16.mxu0 %v3031_v27  ;;  %v3051_v26 = vpack.c.bf16 %v1151_v24, %v1148_v23  ;;  %v1147_v27 = vld [vmem:[%s4868_s11 + $0xf0] sm:$0xff] }
 0x323   :  { %v1143_v24 = vld [vmem:[%s4868_s11 + $0xd0] sm:$0xff] }
 0x3db   :  { %v884_v34 = vpop.f32.mrb[2].mxu0 }
 0x3dc   :  { %v885_v35 = vadd.f32 %v2491_v32, %v884_v34  ;;  %v2747_v36 = vpop.f32.mrb[3].mxu0  ;;  %v3053_v32 = vpack.c.bf16 %v1150_v28, %v1147_v27  ;;  %v3055_v34 = vpack.c.bf16 %v1157_v31, %v1154_v30  ;;  %v1196_v27 = vld [vmem:[%s4868_s11 + $0x278] sm:$0xff]  ;;  %v1199_v28 = vld [vmem:[%s4868_s11 + $0x290] sm:$0xff]  ;;  %v1197_v30 = vld [vmem:[%s4868_s11 + $0x280] sm:$0xff] }
 0x3dd   :  { %v1156_v36 = vld [vmem:[%s4868_s11 + $0x138] sm:$0xff]  ;;  %v3083_v31 = vpack.c.bf16 %v1199_v28, %v1196_v27  ;;  %v1218_v27 = vld [vmem:[%s4868_s11 + $0x328] sm:$0xff] }
 0x3de   :  { %v889_v37 = vmul.f32 1.442695, %v885_v35  ;;  %vm888_vm12 = vcmp.gt.f32.partialorder %v885_v35, 0.0 }
 0x3e0   :  { %3192 = vpow2.f32 %v889_v37  ;;  %v1160_v37 = vld [vmem:[%s4868_s11 + $0x158] sm:$0xff] }
 0x3e1   :  { %v3059_v40 = vpack.c.bf16 %v1163_v38, %v1160_v37  ;;  %v1149_v38 = vld [vmem:[%s4868_s11 + $0x100] sm:$0xff] }
 0x3ea   :  { %v3193_v46 = vpop.eup %3192 }
 0x3eb   :  { %v2493_v47 = vadd.f32 -1.0, %v3193_v46  ;;  %v3063_v46 = vpack.c.bf16 %v1169_v44, %v1166_v43  ;;  %v1203_v43 = vld [vmem:[%s4868_s11 + $0x2b0] sm:$0xff]  ;;  %v3087_v44 = vpack.c.bf16 %v1205_v42, %v1202_v41  ;;  %v1221_v41 = vld [vmem:[%s4868_s11 + $0x340] sm:$0xff]  ;;  %v1224_v42 = vld [vmem:[%s4868_s11 + $0x358] sm:$0xff] }
 0x3ed   :  { %v892_v56 = vsel %vm888_vm12, %v885_v35, %v2493_v47  ;;  %v1153_v35 = vld [vmem:[%s4868_s11 + $0x120] sm:$0xff]  ;;  %vm2050_vm12 = vcmask 665064  }
 0x3ee   :  { %2496 = vmatmul.mubr.msk.f32.vlgmr.msra.gmra.mrb[4].mxu0 %vm726_vm9, %v892_v56  ;;  %2775 = vmatmul.mubr.msk.f32.vlgmr.msra.gmra.mrb[10].mxu1 %vm726_vm9, %v892_v56  ;;  %v3057_v39 = vpack.c.bf16 %v1156_v36, %v1153_v35  ;;  %v1165_v47 = vld [vmem:[%s4868_s11 + $0x180] sm:$0xff]  ;;  %v1198_v35 = vld [vmem:[%s4868_s11 + $0x288] sm:$0xff]  ;;  %vm2408_vm9 = vcmask 648664  }
 0x3ef   :  { %3034 = vmatpush1.bf16.msra.mxu0 %v3033_v19  ;;  %3112 = vmatpush3.bf16.msra.mxu1 %v3111_v50  ;;  %v1168_v19 = vld [vmem:[%s4868_s11 + $0x198] sm:$0xff] }
 0x3f0   :  { %3036 = vmatprep.subr.bf16.mxu0 %v3035_v51  ;;  %3114 = vmatprep.subr.bf16.mxu1 %v3113_v53  ;;  %v3065_v50 = vpack.c.bf16 %v1168_v19, %v1165_v47  ;;  %v3067_v51 = vpack.c.bf16 %v1175_v49, %v1172_v48  ;;  %v1174_v53 = vld [vmem:[%s4868_s11 + $0x1c8] sm:$0xff]  ;;  %v1204_v47 = vld [vmem:[%s4868_s11 + $0x2b8] sm:$0xff]  ;;  %v1155_v49 = vld [vmem:[%s4868_s11 + $0x130] sm:$0xff] }
 0x3f1   :  { %v3069_v56 = vpack.c.bf16 %v1174_v53, %v1171_v52  ;;  %v1208_v52 = vld [vmem:[%s4868_s11 + $0x2d8] sm:$0xff]  ;;  %v1211_v53 = vld [vmem:[%s4868_s11 + $0x2f0] sm:$0xff] }
 0x3f2   :  { %v3091_v55 = vpack.c.bf16 %v1211_v53, %v1208_v52 }
 0x3f3   :  { %3038 = vmatpush1.bf16.msra.mxu0 %v3037_v60  ;;  %3116 = vmatpush3.bf16.msra.mxu1 %v3115_v62  ;;  %v3073_v60 = vpack.c.bf16 %v1180_v59, %v1177_v58  ;;  %v1187_v62 = vld [vmem:[%s4868_s11 + $0x230] sm:$0xff]  ;;  %v1210_v58 = vld [vmem:[%s4868_s11 + $0x2e8] sm:$0xff] }
 0x3f4   :  { %3040 = vmatprep.subr.bf16.mxu0 %v3039_v0  ;;  %3118 = vmatprep.subr.bf16.mxu1 %v3117_v1  ;;  %v1185_v0 = vld [vmem:[%s4868_s11 + $0x220] sm:$0xff]  ;;  %v3075_v33 = vpack.c.bf16 %v1187_v62, %v1184_v61  ;;  %v1188_v1 = vld [vmem:[%s4868_s11 + $0x238] sm:$0xff] }
 0x3f5   :  { %v3121_v6 = vpack.c.bf16 %v1188_v1, %v1185_v0  ;;  %v1161_v61 = vld [vmem:[%s4868_s11 + $0x160] sm:$0xff]  ;;  %v1164_v62 = vld [vmem:[%s4868_s11 + $0x178] sm:$0xff] }
 0x3f6   :  { %v3139_v0 = vpack.c.bf16 %v1164_v62, %v1161_v61  ;;  %v1217_v1 = vld [vmem:[%s4868_s11 + $0x320] sm:$0xff] }
 0x3f7   :  { %3042 = vmatpush1.bf16.msra.mxu0 %v3041_v8  ;;  %3120 = vmatpush3.bf16.msra.mxu1 %v3119_v9  ;;  %v1137_v8 = vld [vmem:[%s4868_s11 + $0xa0] sm:$0xff]  ;;  %v1140_v9 = vld [vmem:[%s4868_s11 + $0xb8] sm:$0xff] }
 0x3f8   :  { %3044 = vmatprep.subr.bf16.mxu0 %v3043_v13  ;;  %v3123_v13 = vpack.c.bf16 %v1140_v9, %v1137_v8  ;;  %3122 = vmatprep.subr.bf16.mxu1 %v3121_v6  ;;  %v937_v6 = vrot.slane %v932_v4, %v3903_v11 }
 0x3fb   :  { %3046 = vmatpush1.bf16.msra.mxu0 %v3045_v18  ;;  %3124 = vmatpush3.bf16.msra.mxu1 %v3123_v13  ;;  %v1194_v18 = vld [vmem:[%s4868_s11 + $0x268] sm:$0xff] }
 0x3fc   :  { %3048 = vmatprep.subr.bf16.mxu0 %v3047_v20  ;;  %v1189_v20 = vld [vmem:[%s4868_s11 + $0x240] sm:$0xff]  ;;  %v3125_v22 = vpack.c.bf16 %v1194_v18, %v1191_v16  ;;  %v945_v18 = vrot.slane %v932_v4, %v3896_v2 }
 0x3fd   :  { %v3081_v23 = vpack.c.bf16 %v1192_v21, %v1189_v20 }
 0x3fe   :  { %3126 = vmatprep.subr.bf16.mxu1 %v3125_v22 }
 0x3ff   :  { %3050 = vmatpush1.bf16.msra.mxu0 %v3049_v25  ;;  %v1146_v25 = vld [vmem:[%s4868_s11 + $0xe8] sm:$0xff] }
 0x400   :  { %3052 = vmatprep.subr.bf16.mxu0 %v3051_v26  ;;  %v3127_v26 = vpack.c.bf16 %v1146_v25, %v1143_v24  ;;  %v1213_v24 = vld [vmem:[%s4868_s11 + $0x300] sm:$0xff]  ;;  %v1216_v25 = vld [vmem:[%s4868_s11 + $0x318] sm:$0xff] }
 0x402   :  { %3128 = vmatpush3.bf16.msra.mxu1 %v3127_v26  ;;  %v1215_v26 = vld [vmem:[%s4868_s11 + $0x310] sm:$0xff] }
 0x403   :  { %3054 = vmatpush1.bf16.msra.mxu0 %v3053_v32  ;;  %v1200_v32 = vld [vmem:[%s4868_s11 + $0x298] sm:$0xff] }
 0x404   :  { %3056 = vmatprep.subr.bf16.mxu0 %v3055_v34  ;;  %v1195_v34 = vld [vmem:[%s4868_s11 + $0x270] sm:$0xff]  ;;  %v3129_v36 = vpack.c.bf16 %v1200_v32, %v1197_v30 }
 0x405   :  { %v3085_v37 = vpack.c.bf16 %v1198_v35, %v1195_v34  ;;  %v1223_v32 = vld [vmem:[%s4868_s11 + $0x350] sm:$0xff]  ;;  %v3097_v35 = vpack.c.bf16 %v1216_v25, %v1213_v24 }
 0x406   :  { %3130 = vmatprep.subr.bf16.mxu1 %v3129_v36  ;;  %v3142_v36 = vpack.c.bf16 %v1218_v27, %v1215_v26 }
 0x407   :  { %3058 = vmatpush1.bf16.msra.mxu0 %v3057_v39  ;;  %v1152_v39 = vld [vmem:[%s4868_s11 + $0x118] sm:$0xff] }
 0x408   :  { %3060 = vmatprep.subr.bf16.mxu0 %v3059_v40  ;;  %v3131_v40 = vpack.c.bf16 %v1152_v39, %v1149_v38 }
 0x40a   :  { %3132 = vmatpush3.bf16.msra.mxu1 %v3131_v40  ;;  %v1222_v40 = vld [vmem:[%s4868_s11 + $0x348] sm:$0xff] }
 0x40b   :  { %3062 = vmatpush1.bf16.msra.mxu0 %v3061_v45  ;;  %v1206_v45 = vld [vmem:[%s4868_s11 + $0x2c8] sm:$0xff] }
 0x40c   :  { %3064 = vmatprep.subr.bf16.mxu0 %v3063_v46  ;;  %v1201_v46 = vld [vmem:[%s4868_s11 + $0x2a0] sm:$0xff]  ;;  %v3133_v19 = vpack.c.bf16 %v1206_v45, %v1203_v43 }
 0x40d   :  { %v3089_v48 = vpack.c.bf16 %v1204_v47, %v1201_v46  ;;  %v1229_v45 = vld [vmem:[%s4868_s11 + $0x380] sm:$0xf]  ;;  %v3145_v47 = vpack.c.bf16 %v1224_v42, %v1221_v41 }
 0x40e   :  { %3134 = vmatprep.subr.bf16.mxu1 %v3133_v19  ;;  %v1225_v19 = vld [vmem:[%s4868_s11 + $0x360] sm:$0xff] }
 0x40f   :  { %3066 = vmatpush1.bf16.msra.mxu0 %v3065_v50  ;;  %v1158_v50 = vld [vmem:[%s4868_s11 + $0x148] sm:$0xff] }
 0x410   :  { %3068 = vmatprep.subr.bf16.mxu0 %v3067_v51  ;;  %v3135_v51 = vpack.c.bf16 %v1158_v50, %v1155_v49  ;;  %v1228_v49 = vld [vmem:[%s4868_s11 + $0x378] sm:$0xf]  ;;  %v1227_v50 = vld [vmem:[%s4868_s11 + $0x370] sm:$0xff] }
 0x411   :  { %v3106_v53 = vpack.c.bf16 %v1228_v49, %v1225_v19 }
 0x412   :  { %3136 = vmatpush3.bf16.msra.mxu1 %v3135_v51  ;;  %v1230_v51 = vld [vmem:[%s4868_s11 + $0x388] sm:$0xf] }
 0x413   :  { %3070 = vmatpush1.bf16.msra.mxu0 %v3069_v56  ;;  %v1212_v56 = vld [vmem:[%s4868_s11 + $0x2f8] sm:$0xff] }
 0x414   :  { %3072 = vmatprep.subr.bf16.mxu0 %v3071_v57  ;;  %v1207_v57 = vld [vmem:[%s4868_s11 + $0x2d0] sm:$0xff]  ;;  %v3137_v59 = vpack.c.bf16 %v1212_v56, %v1209_v54  ;;  %v3148_v54 = vpack.c.bf16 %v1230_v51, %v1227_v50 }
 0x416   :  { %3138 = vmatprep.subr.bf16.mxu1 %v3137_v59 }
 0x417   :  { %3074 = vmatpush1.bf16.msra.mxu0 %v3073_v60  ;;  %v3093_v60 = vpack.c.bf16 %v1210_v58, %v1207_v57  ;;  %3140 = vmatpush3.bf16.msra.mxu1 %v3139_v0 }
 0x418   :  { %3076 = vmatprep.subr.bf16.mxu0 %v3075_v33  ;;  %v1214_v33 = vld [vmem:[%s4868_s11 + $0x308] sm:$0xff]  ;;  %3141 = vmatprep.subr.bf16.mxu1 %v3293_v63 }
 0x419   :  { %v3095_v3 = vpack.c.bf16 %v1217_v1, %v1214_v33 }
 0x41b   :  { %3078 = vmatpush1.bf16.msra.mxu0 %v3077_v7  ;;  %v941_v7 = vrot.slane %v932_v4, %v3906_v12 }
 0x41c   :  { %3080 = vmatprep.subr.bf16.mxu0 %v3079_v17 }
 0x41f   :  { %3082 = vmatpush1.bf16.msra.mxu0 %v3081_v23 }
 0x420   :  { %3084 = vmatprep.subr.bf16.mxu0 %v3083_v31  ;;  %v1220_v31 = vld [vmem:[%s4868_s11 + $0x338] sm:$0xff] }
 0x421   :  { %v3099_v39 = vpack.c.bf16 %v1223_v32, %v1220_v31 }
 0x423   :  { %3086 = vmatpush1.bf16.msra.mxu0 %v3085_v37  ;;  %v1219_v37 = vld [vmem:[%s4868_s11 + $0x330] sm:$0xff] }
 0x424   :  { %3088 = vmatprep.subr.bf16.mxu0 %v3087_v44  ;;  %v1226_v44 = vld [vmem:[%s4868_s11 + $0x368] sm:$0xff]  ;;  %v3101_v46 = vpack.c.bf16 %v1222_v40, %v1219_v37 }
 0x427   :  { %3090 = vmatpush1.bf16.msra.mxu0 %v3089_v48  ;;  %v3103_v48 = vpack.c.bf16 %v1229_v45, %v1226_v44 }
 0x428   :  { %3092 = vmatprep.subr.bf16.mxu0 %v3091_v55 }
 0x42b   :  { %3094 = vmatpush1.bf16.msra.mxu0 %v3093_v60 }
 0x42c   :  { %3096 = vmatprep.subr.bf16.mxu0 %v3095_v3 }
 0x4c1   :  { %v1027_v8 = vpop.f32.mrb[4].mxu0  ;;  %v1098_v9 = vpop.f32.mrb[10].mxu1 }
 0x4c2   :  { %v1028_v13 = vadd.f32 %v1027_v8, %v937_v6  ;;  %v1029_v14 = vpop.f32.mrb[5].mxu0  ;;  %v2776_v15 = vpop.f32.mrb[11].mxu1  ;;  %v1099_v21 = vadd.f32 %v1098_v9, %v945_v18 }
 0x4c3   :  { %v1030_v16 = vadd.f32 %v1029_v14, %v941_v7 }
 0x4c4   :  { %v1105_v17 = vmul.f32 1.442695, %v1028_v13  ;;  %v1109_v22 = vmul.f32 1.442695, %v1099_v21  ;;  %vm1102_vm14 = vcmp.gt.f32.partialorder %v1028_v13, 0.0  ;;  %vm1104_vm15 = vcmp.gt.f32.partialorder %v1099_v21, 0.0 }
 0x4c5   :  { %v1107_v20 = vmul.f32 1.442695, %v1030_v16  ;;  %vm1103_vm13 = vcmp.gt.f32.partialorder %v1030_v16, 0.0 }
 0x4c6   :  { %3194 = vpow2.f32 %v1105_v17 }
 0x4c7   :  { %3196 = vpow2.f32 %v1107_v20 }
 0x4c8   :  { %3198 = vpow2.f32 %v1109_v22 }
 0x4d0   :  { %v3195_v23 = vpop.eup %3194 }
 0x4d1   :  { %v3197_v28 = vpop.eup %3196  ;;  %v2499_v30 = vadd.f32 -1.0, %v3195_v23 }
 0x4d2   :  { %v2500_v34 = vadd.f32 -1.0, %v3197_v28  ;;  %v3199_v52 = vpop.eup %3198 }
 0x4d3   :  { %v1114_v43 = vsel %vm1102_vm14, %v1028_v13, %v2499_v30  ;;  %v2501_v55 = vadd.f32 -1.0, %v3199_v52  ;;  %vm1857_vm14 = vcmask 1042416  }
 0x4d4   :  { %v1115_v38 = vsel %vm1103_vm13, %v1030_v16, %v2500_v34  ;;  %vm2160_vm13 = vcmask 1009464  }
 0x4d5   :  { %1324 = vmatprep.mubr.f32.mxu0 %v1115_v38  ;;  %1466 = vmatprep.mubr.f32.mxu1 %v1115_v38  ;;  %v1116_v56 = vsel %vm1104_vm15, %v1099_v21, %v2501_v55  ;;  %vm1859_vm15 = vcmask 148480  }
 0x4d6   :  { %1325 = vmatmul.mubr.f32.vlgmr.msra.gmra.mrb[6].mxu0 %v1114_v43  ;;  %1467 = vmatmul.mubr.f32.vlgmr.msra.gmra.mrb[12].mxu1 %v1114_v43 }
 0x4d7   :  { %3098 = vmatpush1.bf16.msra.mxu0 %v3097_v35  ;;  %3143 = vmatpush3.bf16.msra.mxu1 %v3142_v36 }
 0x4d8   :  { %3100 = vmatprep.subr.bf16.mxu0 %v3099_v39  ;;  %3144 = vmatprep.subr.bf16.mxu1 %v3293_v63 }
 0x4d9   :  { %1395 = vmatprep.mubr.f32.mxu0 %v3295_v10  ;;  %2789 = vmatprep.mubr.msk.f32.mxu1 %vm3294_vm0, %v3295_v10  ;;  %vm1582_vm0 = vcmask 337064  }
 0x4db   :  { %3102 = vmatpush1.bf16.msra.mxu0 %v3101_v46  ;;  %3146 = vmatpush3.bf16.msra.mxu1 %v3145_v47 }
 0x4dc   :  { %3105 = vmatprep.subr.msk.bf16.mxu0 %vm3933_vm6, %v3103_v48  ;;  %3147 = vmatprep.subr.bf16.mxu1 %v3293_v63  ;;  %v1231_v63 = vld [vmem:[%s4869_s12] sm:$0x7]  ;;  %s3297_s12 = smov 107  }
 0x4dd   :  { %v1244_v59 = vrot.slane %v1231_v63, %v3896_v2  ;;  %v1236_v60 = vrot.slane %v1231_v63, %v3903_v11  ;;  %v1240_v29 = vrot.slane %v1231_v63, %v3906_v12 }
 0x4df   :  { %3108 = vmatpush1.bf16.msk.msra.mxu0 %vm3933_vm6, %v3106_v53  ;;  %3150 = vmatpush3.bf16.msk.msra.mxu1 %vm3933_vm6, %v3148_v54  ;;  %vm1747_vm6 = vcmask 853664  }
 0x4e2   :  { %2504 = vmatmul.mubr.msk.f32.vlgmr.msra.gmra.mrb[6].mxu0 %vm553_vm8, %v1116_v56  ;;  %2790 = vmatmul.mubr.msk.f32.vlgmr.msra.gmra.mrb[14].mxu1 %vm553_vm8, %v1116_v56  ;;  %vm1802_vm8 = vcmask 1025864  }
 0x5a9   :  { %v2660_v10 = vpop.f32.mrb[12].mxu1 }
 0x5aa   :  { %v2661_v57 = vpop.f32.mrb[13].mxu1 }
 0x5ab   :  { %v2662_v58 = vadd.f32 %v2661_v57, %v2660_v10 }
 0x5ad   :  { %v1469_v61 = vadd.f32 %v2662_v58, %v1244_v59 }
 0x5b5   :  { %v1397_v62 = vpop.f32.mrb[6].mxu0  ;;  %v1538_v0 = vpop.f32.mrb[14].mxu1 }
 0x5b6   :  { %v4512_v33 = vadd.f32 %v1397_v62, %v1236_v60  ;;  %v4514_v1 = vadd.f32 %v1538_v0, %v1469_v61  ;;  %v1399_v3 = vpop.f32.mrb[7].mxu0  ;;  %v2791_v4 = vpop.f32.mrb[15].mxu1 }
 0x5b7   :  { %v4516_v6 = vadd.f32 %v1399_v3, %v1240_v29 }
 0x5b8   :  { %v1583_v7 = vsel %vm1582_vm0, %v4512_v33, -inf  ;;  %v1543_v2 = vsel %vm1542_vm1, %v4512_v33, -inf  ;;  %v1638_v8 = vsel %vm1637_vm2, %v4512_v33, -inf  ;;  %v1693_v13 = vsel %vm1692_vm4, %v4512_v33, -inf }
 0x5b9   :  { %1584 = vmax.xlane.f32.xlu1 %v1583_v7  ;;  %1544 = vmax.xlane.f32.xlu0 %v1543_v2  ;;  %v1996_v9 = vsel %vm1995_vm3, %v4516_v6, -inf  ;;  %v2299_v14 = vsel %vm2298_vm5, %v4514_v1, -inf  ;;  %v1748_v15 = vsel %vm1747_vm6, %v4512_v33, -inf  ;;  %v2354_v16 = vsel %vm2353_vm7, %v4514_v1, -inf }
 0x5ba   :  { %v1803_v17 = vsel %vm1802_vm8, %v4512_v33, -inf  ;;  %v2409_v18 = vsel %vm2408_vm9, %v4514_v1, -inf  ;;  %v1941_v20 = vsel %vm1940_vm10, %v4516_v6, -inf  ;;  %v2106_v21 = vsel %vm2105_vm11, %v4516_v6, -inf }
 0x5bb   :  { %v2051_v22 = vsel %vm2050_vm12, %v4516_v6, -inf  ;;  %v2161_v23 = vsel %vm2160_vm13, %v4516_v6, -inf  ;;  %v1858_v24 = vsel %vm1857_vm14, %v4512_v33, -inf  ;;  %v1860_v25 = vsel %vm1859_vm15, %v4516_v6, -inf }
 0x5bc   :  { %vm2215_vm0 = vcmask 1042400   ;;  %vm2217_vm2 = vcmask 132096   ;;  %v1861_v26 = vmax.f32 %v1858_v24, %v1860_v25  ;;  %vm1579_vm3 = vcmask 163840  }
 0x5bd   :  { %1639 = vmax.xlane.f32.xlu1 %v1638_v8  ;;  %1997 = vmax.xlane.f32.xlu0 %v1996_v9  ;;  %v2216_v27 = vsel %vm2215_vm0, %v4516_v6, -inf  ;;  %v2218_v28 = vsel %vm2217_vm2, %v4514_v1, -inf  ;;  %vm1876_vm4 = vcmask 15360   ;;  %vm2234_vm5 = vcmask 31744  }
 0x5be   :  { %v2219_v30 = vmax.f32 %v2216_v27, %v2218_v28 }
 0x5c1   :  { %1694 = vmax.xlane.f32.xlu1 %v1693_v13  ;;  %2300 = vmax.xlane.f32.xlu0 %v2299_v14 }
 0x5c5   :  { %1749 = vmax.xlane.f32.xlu1 %v1748_v15  ;;  %2355 = vmax.xlane.f32.xlu0 %v2354_v16 }
 0x5c9   :  { %1804 = vmax.xlane.f32.xlu1 %v1803_v17  ;;  %2410 = vmax.xlane.f32.xlu0 %v2409_v18 }
 0x5cd   :  { %1942 = vmax.xlane.f32.xlu1 %v1941_v20  ;;  %2107 = vmax.xlane.f32.xlu0 %v2106_v21 }
 0x5d1   :  { %2052 = vmax.xlane.f32.xlu1 %v2051_v22  ;;  %2162 = vmax.xlane.f32.xlu0 %v2161_v23 }
 0x5d5   :  { %1862 = vmax.xlane.f32.xlu0 %v1861_v26 }
 0x5d9   :  { %2220 = vmax.xlane.f32.xlu0 %v2219_v30 }
 0x646   :  { %v1585_v31 = vpop.xlane.xlu1 %1584  ;;  %v4537_v32 = vpop.xlane.xlu0 %1544 }
 0x647   :  { %v1586_v34 = vsub.f32 %v4512_v33, %v1585_v31  ;;  %v1546_v9 = vsub.f32 %v4512_v33, %v4537_v32 }
 0x649   :  { %v1587_v35 = vmul.f32 1.442695, %v1586_v34  ;;  %v1547_v15 = vmul.f32 1.442695, %v1546_v9 }
 0x64a   :  { %v1640_v36 = vpop.xlane.xlu1 %1639  ;;  %v1998_v37 = vpop.xlane.xlu0 %1997 }
 0x64b   :  { %3200 = vpow2.f32 %v1587_v35  ;;  %v1641_v38 = vsub.f32 %v4512_v33, %v1640_v36  ;;  %v1999_v39 = vsub.f32 %v4516_v6, %v1998_v37 }
 0x64d   :  { %v1642_v40 = vmul.f32 1.442695, %v1641_v38  ;;  %v2000_v41 = vmul.f32 1.442695, %v1999_v39 }
 0x64e   :  { %v1695_v42 = vpop.xlane.xlu1 %1694  ;;  %v2301_v43 = vpop.xlane.xlu0 %2300 }
 0x64f   :  { %3202 = vpow2.f32 %v1642_v40  ;;  %v1696_v44 = vsub.f32 %v4512_v33, %v1695_v42  ;;  %v2302_v61 = vsub.f32 %v4514_v1, %v2301_v43 }
 0x650   :  { %3204 = vpow2.f32 %v2000_v41 }
 0x651   :  { %v1697_v45 = vmul.f32 1.442695, %v1696_v44  ;;  %v2303_v3 = vmul.f32 1.442695, %v2302_v61 }
 0x652   :  { %v1750_v46 = vpop.xlane.xlu1 %1749  ;;  %v2356_v47 = vpop.xlane.xlu0 %2355 }
 0x653   :  { %3206 = vpow2.f32 %v1697_v45  ;;  %v1751_v19 = vsub.f32 %v4512_v33, %v1750_v46  ;;  %v2357_v4 = vsub.f32 %v4514_v1, %v2356_v47 }
 0x655   :  { %v4544_v48 = vpop.eup %3200  ;;  %v1752_v49 = vmul.f32 1.442695, %v1751_v19  ;;  %v2358_v2 = vmul.f32 1.442695, %v2357_v4 }
 0x656   :  { %1590 = vrot.lane.b32.xlu1 %v4544_v48, %s3297_s12  ;;  %v1805_v50 = vpop.xlane.xlu1 %1804  ;;  %v2411_v51 = vpop.xlane.xlu0 %2410 }
 0x657   :  { %3208 = vpow2.f32 %v1752_v49  ;;  %v1806_v52 = vsub.f32 %v4512_v33, %v1805_v50  ;;  %v2412_v8 = vsub.f32 %v4514_v1, %v2411_v51 }
 0x659   :  { %v4549_v53 = vpop.eup %3202  ;;  %v1807_v54 = vmul.f32 1.442695, %v1806_v52  ;;  %v2413_v13 = vmul.f32 1.442695, %v2412_v8 }
 0x65a   :  { %v4551_v55 = vpop.eup %3204  ;;  %v2108_v56 = vpop.xlane.xlu0 %2107  ;;  %1645 = vrot.lane.b32.xlu0 %v4549_v53, %s3298_s2 }
 0x65b   :  { %3210 = vpow2.f32 %v1807_v54  ;;  %2003 = vrot.lane.b32.xlu1 %v4551_v55, %s3299_s24  ;;  %v2109_v10 = vsub.f32 %v4516_v6, %v2108_v56  ;;  %v1943_v20 = vpop.xlane.xlu1 %1942 }
 0x65c   :  { %v1944_v22 = vsub.f32 %v4516_v6, %v1943_v20 }
 0x65d   :  { %v4558_v57 = vpop.eup %3206  ;;  %v2110_v58 = vmul.f32 1.442695, %v2109_v10 }
 0x65e   :  { %v2163_v63 = vpop.xlane.xlu0 %2162  ;;  %1700 = vrot.lane.b32.xlu0 %v4558_v57, %s3300_s25  ;;  %v1945_v24 = vmul.f32 1.442695, %v1944_v22 }
 0x65f   :  { %3212 = vpow2.f32 %v2110_v58  ;;  %v2053_v23 = vpop.xlane.xlu1 %2052  ;;  %v2164_v27 = vsub.f32 %v4516_v6, %v2163_v63 }
 0x660   :  { %v2054_v25 = vsub.f32 %v4516_v6, %v2053_v23 }
 0x661   :  { %v4562_v59 = vpop.eup %3208  ;;  %v2165_v28 = vmul.f32 1.442695, %v2164_v27 }
 0x662   :  { %v1863_v60 = vpop.xlane.xlu0 %1862  ;;  %1755 = vrot.lane.b32.xlu0 %v4562_v59, %s3301_s8  ;;  %v2055_v26 = vmul.f32 1.442695, %v2054_v25 }
 0x663   :  { %v1864_v29 = vsub.f32 %v4512_v33, %v1863_v60  ;;  %v1865_v30 = vsub.f32 %v4516_v6, %v1863_v60 }
 0x665   :  { %v4568_v62 = vpop.eup %3210  ;;  %v1866_v0 = vmul.f32 1.442695, %v1864_v29  ;;  %v1868_v32 = vmul.f32 1.442695, %v1865_v30  ;;  %v3312_v29 = vmov 1966171168  }
 0x666   :  { %1810 = vrot.lane.b32.xlu0 %v4568_v62, %s3302_s4  ;;  %v2221_v31 = vpop.xlane.xlu0 %2220 }
 0x667   :  { %3214 = vpow2.f32 %v1866_v0  ;;  %v2222_v34 = vsub.f32 %v4516_v6, %v2221_v31  ;;  %v2223_v36 = vsub.f32 %v4514_v1, %v2221_v31  ;;  %v1556_v0 = vunpack.c.l.s4 %v3312_v29 }
 0x668   :  { %3216 = vpow2.f32 %v2303_v3 }
 0x669   :  { %v4573_v7 = vpop.eup %3212  ;;  %3218 = vpow2.f32 %v2358_v2  ;;  %v2224_v37 = vmul.f32 1.442695, %v2222_v34  ;;  %v2226_v39 = vmul.f32 1.442695, %v2223_v36  ;;  %v1557_v2 = vunpack.c.0.s8 %v1556_v0 }
 0x66a   :  { %2113 = vrot.lane.b32.xlu1 %v4573_v7, %s3303_s26  ;;  %3220 = vpow2.f32 %v2413_v13 }
 0x66b   :  { %3222 = vpow2.f32 %v1547_v15  ;;  %v4640_v13 = vsub.s32 %v1557_v2, %v3524_v5 }
 0x66c   :  { %3224 = vpow2.f32 %v1945_v24 }
 0x66d   :  { %3226 = vpow2.f32 %v2055_v26 }
 0x66e   :  { %3228 = vpow2.f32 %v2165_v28 }
 0x66f   :  { %3230 = vpow2.f32 %v1868_v32 }
 0x670   :  { %3232 = vpow2.f32 %v2224_v37 }
 0x671   :  { %v4580_v14 = vpop.eup %3214  ;;  %3234 = vpow2.f32 %v2226_v39 }
 0x672   :  { %1872 = vrot.lane.b32.xlu1 %v4580_v14, %s3304_s27  ;;  %v4584_v16 = vpop.eup %3216 }
 0x673   :  { %v4588_v17 = vpop.eup %3218 }
 0x674   :  { %v4592_v33 = vpop.eup %3220 }
 0x675   :  { %v4596_v18 = vpop.eup %3222 }
 0x676   :  { %2306 = vrot.lane.b32.xlu1 %v4584_v16, %s3305_s6  ;;  %v1549_v21 = vsel %vm1542_vm1, %v4596_v18, 0.0  ;;  %v4605_v35 = vpop.eup %3224 }
 0x677   :  { %v4610_v38 = vpop.eup %3226 }
 0x678   :  { %v4614_v40 = vpop.eup %3228 }
 0x679   :  { %v4618_v6 = vpop.eup %3230 }
 0x67a   :  { %2361 = vrot.lane.b32.xlu1 %v4588_v17, %s3306_s28  ;;  %v4622_v1 = vpop.eup %3232 }
 0x67b   :  { %v4626_v41 = vpop.eup %3234 }
 0x67e   :  { %2416 = vrot.lane.b32.xlu1 %v4592_v33, %s3307_s29 }
 0x685   :  { %1550 = vadd.xlane.f32.xlu0 %v1549_v21 }
 0x69b   :  { %1948 = vrot.lane.b32.xlu0 %v4605_v35, %s3308_s30 }
 0x69f   :  { %2058 = vrot.lane.b32.xlu0 %v4610_v38, %s3309_s14 }
 0x6a3   :  { %2168 = vrot.lane.b32.xlu0 %v4614_v40, %s3310_s15 }
 0x6a7   :  { %1874 = vrot.lane.b32.xlu0 %v4618_v6, %s3304_s27 }
 0x6ab   :  { %2230 = vrot.lane.b32.xlu0 %v4622_v1, %s3311_s16 }
 0x6af   :  { %2232 = vrot.lane.b32.xlu0 %v4626_v41, %s3311_s16 }
 0x6c8   :  { %v1591_v42 = vpop.permute.xlu1 %1590 }
 0x6c9   :  { %v1593_v44 = vsel %vm1542_vm1, %v1591_v42, 0.0 }
 0x6cc   :  { %v1646_v43 = vpop.permute.xlu0 %1645 }
 0x6cd   :  { %v1648_v46 = vsel %vm1542_vm1, %v1646_v43, 0.0  ;;  %v2004_v51 = vpop.permute.xlu1 %2003 }
 0x6ce   :  { %1594 = vadd.xlane.f32.xlu0 %v1593_v44  ;;  %v2006_v9 = vsel %vm1542_vm1, %v2004_v51, 0.0 }
 0x6d0   :  { %v1701_v45 = vpop.permute.xlu0 %1700 }
 0x6d1   :  { %v1703_v19 = vsel %vm1542_vm1, %v1701_v45, 0.0 }
 0x6d2   :  { %1649 = vadd.xlane.f32.xlu0 %v1648_v46 }
 0x6d4   :  { %v1756_v47 = vpop.permute.xlu0 %1755 }
 0x6d5   :  { %v1758_v49 = vsel %vm1542_vm1, %v1756_v47, 0.0 }
 0x6d6   :  { %1704 = vadd.xlane.f32.xlu0 %v1703_v19 }
 0x6d8   :  { %v1811_v50 = vpop.permute.xlu0 %1810 }
 0x6d9   :  { %v1813_v52 = vsel %vm1542_vm1, %v1811_v50, 0.0 }
 0x6da   :  { %1759 = vadd.xlane.f32.xlu0 %v1758_v49 }
 0x6dc   :  { %v2114_v54 = vpop.permute.xlu1 %2113 }
 0x6dd   :  { %v2116_v27 = vsel %vm1542_vm1, %v2114_v54, 0.0 }
 0x6de   :  { %1814 = vadd.xlane.f32.xlu0 %v1813_v52 }
 0x6e4   :  { %v1873_v56 = vpop.permute.xlu1 %1872 }
 0x6e8   :  { %v2307_v10 = vpop.permute.xlu1 %2306 }
 0x6e9   :  { %v2309_v58 = vsel %vm1542_vm1, %v2307_v10, 0.0 }
 0x6ea   :  { %2310 = vadd.xlane.f32.xlu0 %v2309_v58 }
 0x6ec   :  { %v2362_v63 = vpop.permute.xlu1 %2361 }
 0x6ed   :  { %v2364_v60 = vsel %vm1542_vm1, %v2362_v63, 0.0 }
 0x6ee   :  { %2365 = vadd.xlane.f32.xlu1 %v2364_v60 }
 0x6f0   :  { %v2417_v36 = vpop.permute.xlu1 %2416 }
 0x6f1   :  { %v2419_v39 = vsel %vm1542_vm1, %v2417_v36, 0.0 }
 0x712   :  { %v1551_v61 = vpop.xlane.xlu0 %1550 }
 0x713   :  { %3236 = vrcp.f32 %v1551_v61 }
 0x716   :  { %v1949_v3 = vpop.permute.xlu0 %1948 }
 0x717   :  { %v1951_v4 = vsel %vm1542_vm1, %v1949_v3, 0.0 }
 0x718   :  { %1952 = vadd.xlane.f32.xlu1 %v1951_v4 }
 0x71a   :  { %v2059_v8 = vpop.permute.xlu0 %2058 }
 0x71b   :  { %v2061_v22 = vsel %vm1542_vm1, %v2059_v8, 0.0 }
 0x71c   :  { %2007 = vadd.xlane.f32.xlu1 %v2006_v9 }
 0x71d   :  { %v3237_v15 = vpop.eup %3236 }
 0x71e   :  { %v1553_v20 = vmul.f32 %v3237_v15, %v4596_v18  ;;  %v2169_v21 = vpop.permute.xlu0 %2168 }
 0x71f   :  { %v2171_v28 = vsel %vm1542_vm1, %v2169_v21, 0.0 }
 0x720   :  { %v1561_v23 = vrot.slane %v1553_v20, %v4640_v13  ;;  %2062 = vadd.xlane.f32.xlu1 %v2061_v22 }
 0x722   :  { %v1562_v24 = vcombine.high %v1561_v23, %v1561_v23  ;;  %v1569_v25 = vrot.slane %v1561_v23, %v4640_v13  ;;  %v1875_v26 = vpop.permute.xlu0 %1874 }
 0x723   :  { %v1877_v30 = vsel %vm1876_vm4, %v1873_v56, %v1875_v26 }
 0x724   :  { %v1576_v5 = vrot.slane %v1562_v24, %v4640_v13  ;;  %1580 = vst.msk [vmem:[#allocation2] sm:$0x1] %vm1579_vm3, %v1569_v25  ;;  %2117 = vadd.xlane.f32.xlu1 %v2116_v27  ;;  %v1879_v32 = vsel %vm1542_vm1, %v1877_v30, 0.0 }
 0x726   :  { %1581 = vst.msk [vmem:[#allocation2 + $0x10] sm:$0x1] %vm1579_vm3, %v1576_v5  ;;  %v2231_v18 = vpop.permute.xlu0 %2230 }
 0x728   :  { %2172 = vadd.xlane.f32.xlu1 %v2171_v28 }
 0x72a   :  { %v2233_v31 = vpop.permute.xlu0 %2232 }
 0x72b   :  { %v2235_v34 = vsel %vm2234_vm5, %v2231_v18, %v2233_v31 }
 0x72c   :  { %1880 = vadd.xlane.f32.xlu1 %v1879_v32  ;;  %v2237_v37 = vsel %vm1542_vm1, %v2235_v34, 0.0 }
 0x72d   :  { %2238 = vadd.xlane.f32.xlu0 %v2237_v37 }
 0x730   :  { %2420 = vadd.xlane.f32.xlu1 %v2419_v39 }
 0x75b   :  { %v1595_v42 = vpop.xlane.xlu0 %1594 }
 0x75c   :  { %3238 = vrcp.f32 %v1595_v42 }
 0x75f   :  { %v1650_v43 = vpop.xlane.xlu0 %1649 }
 0x760   :  { %3240 = vrcp.f32 %v1650_v43 }
 0x763   :  { %v1705_v44 = vpop.xlane.xlu0 %1704 }
 0x764   :  { %3242 = vrcp.f32 %v1705_v44 }
 0x766   :  { %v3239_v45 = vpop.eup %3238 }
 0x767   :  { %v1760_v46 = vpop.xlane.xlu0 %1759  ;;  %v1597_v47 = vmul.f32 %v3239_v45, %v4544_v48 }
 0x768   :  { %3244 = vrcp.f32 %v1760_v46 }
 0x769   :  { %v1605_v19 = vrot.slane %v1597_v47, %v4640_v13 }
 0x76a   :  { %v3241_v49 = vpop.eup %3240 }
 0x76b   :  { %v1815_v50 = vpop.xlane.xlu0 %1814  ;;  %v1613_v51 = vrot.slane %v1605_v19, %v4640_v13  ;;  %v1652_v52 = vmul.f32 %v3241_v49, %v4549_v53  ;;  %v1606_v24 = vcombine.high %v1605_v19, %v1605_v19 }
 0x76c   :  { %3246 = vrcp.f32 %v1815_v50 }
 0x76d   :  { %v1624_v54 = vrot.slane %v1613_v51, %v3903_v11  ;;  %v4662_v56 = vrot.slane %v1652_v52, %v4640_v13  ;;  %v1620_v28 = vrot.slane %v1606_v24, %v4640_v13 }
 0x76e   :  { %v3243_v10 = vpop.eup %3242 }
 0x76f   :  { %1629 = vrot.lane.b32.xlu0 %v1624_v54, %s3297_s12  ;;  %v1668_v48 = vrot.slane %v4662_v56, %v4640_v13  ;;  %v1707_v58 = vmul.f32 %v3243_v10, %v4558_v57  ;;  %v1628_v32 = vrot.slane %v1620_v28, %v3903_v11 }
 0x771   :  { %v1679_v63 = vrot.slane %v1668_v48, %v3903_v11  ;;  %v4670_v60 = vrot.slane %v1707_v58, %v4640_v13 }
 0x772   :  { %v3245_v53 = vpop.eup %3244 }
 0x773   :  { %1684 = vrot.lane.b32.xlu1 %v1679_v63, %s3298_s2  ;;  %v1723_v61 = vrot.slane %v4670_v60, %v4640_v13  ;;  %v1762_v29 = vmul.f32 %v3245_v53, %v4562_v59 }
 0x775   :  { %v1734_v0 = vrot.slane %v1723_v61, %v3903_v11  ;;  %v4678_v3 = vrot.slane %v1762_v29, %v4640_v13 }
 0x776   :  { %v3247_v4 = vpop.eup %3246 }
 0x777   :  { %1739 = vrot.lane.b32.xlu1 %v1734_v0, %s3300_s25  ;;  %v2311_v57 = vpop.xlane.xlu0 %2310  ;;  %v1778_v2 = vrot.slane %v4678_v3, %v4640_v13  ;;  %v1817_v8 = vmul.f32 %v3247_v4, %v4568_v62 }
 0x778   :  { %3248 = vrcp.f32 %v2311_v57 }
 0x779   :  { %v1789_v9 = vrot.slane %v1778_v2, %v3903_v11  ;;  %v1825_v15 = vrot.slane %v1817_v8, %v4640_v13 }
 0x77b   :  { %v2366_v59 = vpop.xlane.xlu1 %2365  ;;  %1794 = vrot.lane.b32.xlu1 %v1789_v9, %s3301_s8  ;;  %v1833_v20 = vrot.slane %v1825_v15, %v4640_v13  ;;  %v1826_v30 = vcombine.high %v1825_v15, %v1825_v15 }
 0x77c   :  { %3250 = vrcp.f32 %v2366_v59 }
 0x77d   :  { %v1844_v21 = vrot.slane %v1833_v20, %v3903_v11  ;;  %v1840_v34 = vrot.slane %v1826_v30, %v4640_v13 }
 0x77f   :  { %1849 = vrot.lane.b32.xlu1 %v1844_v21, %s3302_s4  ;;  %v1848_v36 = vrot.slane %v1840_v34, %v3903_v11 }
 0x782   :  { %v3249_v22 = vpop.eup %3248 }
 0x783   :  { %v2313_v23 = vmul.f32 %v3249_v22, %v4584_v16 }
 0x785   :  { %v2321_v62 = vrot.slane %v2313_v23, %v4640_v13 }
 0x786   :  { %v3251_v25 = vpop.eup %3250 }
 0x787   :  { %v2329_v26 = vrot.slane %v2321_v62, %v4640_v13  ;;  %v2368_v27 = vmul.f32 %v3251_v25, %v4588_v17  ;;  %v2322_v17 = vcombine.high %v2321_v62, %v2321_v62 }
 0x789   :  { %v2340_v5 = vrot.slane %v2329_v26, %v3903_v11  ;;  %v4696_v18 = vrot.slane %v2368_v27, %v4640_v13  ;;  %v2336_v37 = vrot.slane %v2322_v17, %v4640_v13  ;;  %v1661_v26 = vcombine.high %v4662_v56, %v4662_v56 }
 0x78b   :  { %2345 = vrot.lane.b32.xlu1 %v2340_v5, %s3305_s6  ;;  %v2384_v16 = vrot.slane %v4696_v18, %v4640_v13  ;;  %v2344_v39 = vrot.slane %v2336_v37, %v3903_v11  ;;  %v1675_v56 = vrot.slane %v1661_v26, %v4640_v13 }
 0x78d   :  { %v2395_v31 = vrot.slane %v2384_v16, %v3903_v11  ;;  %v1716_v16 = vcombine.high %v4670_v60, %v4670_v60 }
 0x78f   :  { %2400 = vrot.lane.b32.xlu0 %v2395_v31, %s3306_s28  ;;  %1631 = vrot.lane.b32.xlu1 %v1628_v32, %s3297_s12  ;;  %v1730_v17 = vrot.slane %v1716_v16, %v4640_v13 }
 0x793   :  { %1851 = vrot.lane.b32.xlu1 %v1848_v36, %s3302_s4 }
 0x797   :  { %2347 = vrot.lane.b32.xlu1 %v2344_v39, %s3305_s6 }
 0x7a5   :  { %v1953_v42 = vpop.xlane.xlu1 %1952 }
 0x7a6   :  { %3252 = vrcp.f32 %v1953_v42  ;;  %v1738_v42 = vrot.slane %v1730_v17, %v3903_v11 }
 0x7a9   :  { %v2008_v43 = vpop.xlane.xlu1 %2007 }
 0x7aa   :  { %3254 = vrcp.f32 %v2008_v43 }
 0x7ad   :  { %v2063_v44 = vpop.xlane.xlu1 %2062 }
 0x7ae   :  { %3256 = vrcp.f32 %v2063_v44 }
 0x7b0   :  { %v3253_v45 = vpop.eup %3252 }
 0x7b1   :  { %v2118_v46 = vpop.xlane.xlu1 %2117  ;;  %v1955_v47 = vmul.f32 %v3253_v45, %v4605_v35 }
 0x7b2   :  { %3258 = vrcp.f32 %v2118_v46 }
 0x7b3   :  { %v1963_v19 = vrot.slane %v1955_v47, %v4640_v13 }
 0x7b4   :  { %v3255_v49 = vpop.eup %3254 }
 0x7b5   :  { %v2173_v50 = vpop.xlane.xlu1 %2172  ;;  %v1971_v51 = vrot.slane %v1963_v19, %v4640_v13  ;;  %v1964_v52 = vcombine.high %v1963_v19, %v1963_v19  ;;  %v2010_v54 = vmul.f32 %v3255_v49, %v4551_v55  ;;  %v2377_v19 = vcombine.high %v4696_v18, %v4696_v18 }
 0x7b6   :  { %3260 = vrcp.f32 %v2173_v50 }
 0x7b7   :  { %v1982_v10 = vrot.slane %v1971_v51, %v3903_v11  ;;  %v1978_v48 = vrot.slane %v1964_v52, %v4640_v13  ;;  %v4719_v58 = vrot.slane %v2010_v54, %v4640_v13  ;;  %v2391_v52 = vrot.slane %v2377_v19, %v4640_v13 }
 0x7b8   :  { %v3257_v63 = vpop.eup %3256 }
 0x7b9   :  { %1987 = vrot.lane.b32.xlu0 %v1982_v10, %s3308_s30  ;;  %v1986_v35 = vrot.slane %v1978_v48, %v3903_v11  ;;  %v2026_v53 = vrot.slane %v4719_v58, %v4640_v13  ;;  %v2065_v61 = vmul.f32 %v3257_v63, %v4610_v38  ;;  %v1881_v9 = vpop.xlane.xlu1 %1880 }
 0x7ba   :  { %v2239_v29 = vpop.xlane.xlu0 %2238 }
 0x7bb   :  { %3262 = vrcp.f32 %v2239_v29  ;;  %1989 = vrot.lane.b32.xlu1 %v1986_v35, %s3308_s30  ;;  %v2037_v55 = vrot.slane %v2026_v53, %v3903_v11  ;;  %v2073_v0 = vrot.slane %v2065_v61, %v4640_v13 }
 0x7bc   :  { %v3259_v4 = vpop.eup %3258  ;;  %3264 = vrcp.f32 %v1881_v9 }
 0x7bd   :  { %2042 = vrot.lane.b32.xlu0 %v2037_v55, %s3299_s24  ;;  %v2081_v57 = vrot.slane %v2073_v0, %v4640_v13  ;;  %v2074_v2 = vcombine.high %v2073_v0, %v2073_v0  ;;  %v2120_v8 = vmul.f32 %v3259_v4, %v4573_v7  ;;  %v2421_v54 = vpop.xlane.xlu1 %2420 }
 0x7be   :  { %3266 = vrcp.f32 %v2421_v54 }
 0x7bf   :  { %v2092_v15 = vrot.slane %v2081_v57, %v3903_v11  ;;  %v2088_v38 = vrot.slane %v2074_v2, %v4640_v13  ;;  %v2128_v59 = vrot.slane %v2120_v8, %v4640_v13 }
 0x7c0   :  { %v3261_v20 = vpop.eup %3260 }
 0x7c1   :  { %2097 = vrot.lane.b32.xlu0 %v2092_v15, %s3309_s14  ;;  %v2096_v21 = vrot.slane %v2088_v38, %v3903_v11  ;;  %v2136_v22 = vrot.slane %v2128_v59, %v4640_v13  ;;  %v2129_v23 = vcombine.high %v2128_v59, %v2128_v59  ;;  %v2175_v62 = vmul.f32 %v3261_v20, %v4614_v40 }
 0x7c3   :  { %2099 = vrot.lane.b32.xlu1 %v2096_v21, %s3309_s14  ;;  %v2147_v7 = vrot.slane %v2136_v22, %v3903_v11  ;;  %v2143_v24 = vrot.slane %v2129_v23, %v4640_v13  ;;  %v2183_v25 = vrot.slane %v2175_v62, %v4640_v13 }
 0x7c5   :  { %v3263_v27 = vpop.eup %3262  ;;  %2152 = vrot.lane.b32.xlu0 %v2147_v7, %s3303_s26  ;;  %v2151_v5 = vrot.slane %v2143_v24, %v3903_v11  ;;  %v2191_v28 = vrot.slane %v2183_v25, %v4640_v13  ;;  %v2184_v50 = vcombine.high %v2183_v25, %v2183_v25 }
 0x7c6   :  { %v2241_v40 = vmul.f32 %v3263_v27, %v4622_v1  ;;  %v2242_v30 = vmul.f32 %v3263_v27, %v4626_v41  ;;  %v1683_v1 = vrot.slane %v1675_v56, %v3903_v11  ;;  %v1771_v41 = vcombine.high %v4678_v3, %v4678_v3  ;;  %v3265_v36 = vpop.eup %3264 }
 0x7c7   :  { %2154 = vrot.lane.b32.xlu1 %v2151_v5, %s3303_s26  ;;  %v2202_v31 = vrot.slane %v2191_v28, %v3903_v11  ;;  %v1883_v44 = vmul.f32 %v3265_v36, %v4580_v14  ;;  %v1884_v45 = vmul.f32 %v3265_v36, %v4618_v6  ;;  %v2019_v3 = vcombine.high %v4719_v58, %v4719_v58 }
 0x7c8   :  { %v2245_v32 = vcombine.low %v2241_v40, %v2242_v30  ;;  %v1785_v46 = vrot.slane %v1771_v41, %v4640_v13  ;;  %v2198_v48 = vrot.slane %v2184_v50, %v4640_v13  ;;  %v2399_v58 = vrot.slane %v2391_v52, %v3903_v11  ;;  %v3267_v0 = vpop.eup %3266 }
 0x7c9   :  { %2207 = vrot.lane.b32.xlu0 %v2202_v31, %s3310_s15  ;;  %v2033_v14 = vrot.slane %v2019_v3, %v4640_v13  ;;  %v1887_v6 = vcombine.low %v1883_v44, %v1884_v45  ;;  %v2423_v8 = vmul.f32 %v3267_v0, %v4592_v33 }
 0x7ca   :  { %v2252_v34 = vrot.slane %v2245_v32, %v4640_v13  ;;  %v1793_v49 = vrot.slane %v1785_v46, %v3903_v11  ;;  %v2206_v63 = vrot.slane %v2198_v48, %v3903_v11 }
 0x7cb   :  { %v2041_v10 = vrot.slane %v2033_v14, %v3903_v11  ;;  %v1894_v18 = vrot.slane %v1887_v6, %v4640_v13  ;;  %v2431_v38 = vrot.slane %v2423_v8, %v4640_v13 }
 0x7cc   :  { %v2260_v60 = vrot.slane %v2252_v34, %v4640_v13  ;;  %v2253_v37 = vcombine.high %v2252_v34, %v2252_v34 }
 0x7cd   :  { %1686 = vrot.lane.b32.xlu0 %v1683_v1, %s3298_s2  ;;  %v1902_v35 = vrot.slane %v1894_v18, %v4640_v13  ;;  %v1895_v55 = vcombine.high %v1894_v18, %v1894_v18  ;;  %v2439_v21 = vrot.slane %v2431_v38, %v4640_v13  ;;  %v2432_v22 = vcombine.high %v2431_v38, %v2431_v38 }
 0x7ce   :  { %v2271_v39 = vrot.slane %v2260_v60, %v3903_v11  ;;  %v2267_v43 = vrot.slane %v2253_v37, %v4640_v13  ;;  %v2275_v57 = vrot.slane %v2260_v60, %v3906_v12 }
 0x7cf   :  { %v1913_v53 = vrot.slane %v1902_v35, %v3903_v11  ;;  %v1917_v29 = vrot.slane %v1902_v35, %v3906_v12  ;;  %v1909_v2 = vrot.slane %v1895_v55, %v4640_v13  ;;  %v2450_v23 = vrot.slane %v2439_v21, %v3903_v11 }
 0x7d0   :  { %2284 = vrot.lane.b32.xlu1 %v2271_v39, %s3311_s16  ;;  %v2279_v47 = vrot.slane %v2267_v43, %v3903_v11  ;;  %v2283_v51 = vrot.slane %v2267_v43, %v3906_v12  ;;  %v2446_v62 = vrot.slane %v2432_v22, %v4640_v13 }
 0x7d1   :  { %1741 = vrot.lane.b32.xlu0 %v1738_v42, %s3300_s25  ;;  %v1921_v15 = vrot.slane %v1909_v2, %v3903_v11  ;;  %v1925_v20 = vrot.slane %v1909_v2, %v3906_v12 }
 0x7d2   :  { %v2454_v7 = vrot.slane %v2446_v62, %v3903_v11 }
 0x7d4   :  { %2288 = vrot.lane.b32.xlu1 %v2279_v47, %s3311_s16 }
 0x7d5   :  { %1796 = vrot.lane.b32.xlu0 %v1793_v49, %s3301_s8 }
 0x7d8   :  { %2290 = vrot.lane.b32.xlu1 %v2283_v51, %s3311_s16 }
 0x7d9   :  { %2044 = vrot.lane.b32.xlu0 %v2041_v10, %s3299_s24 }
 0x7dc   :  { %2402 = vrot.lane.b32.xlu1 %v2399_v58, %s3306_s28 }
 0x7dd   :  { %2209 = vrot.lane.b32.xlu0 %v2206_v63, %s3310_s15 }
 0x7e1   :  { %1926 = vrot.lane.b32.xlu0 %v1913_v53, %s3304_s27  ;;  %v1630_v61 = vpop.permute.xlu0 %1629 }
 0x7e2   :  { %1635 = vst.msk [vmem:[#allocation2 + $0x1] sm:$0x1] %vm1579_vm3, %v1630_v61 }
 0x7e5   :  { %v1685_v4 = vpop.permute.xlu1 %1684  ;;  %1928 = vrot.lane.b32.xlu0 %v1917_v29, %s3304_s27 }
 0x7e6   :  { %1690 = vst.msk [vmem:[#allocation2 + $0x2] sm:$0x1] %vm1579_vm3, %v1685_v4 }
 0x7e9   :  { %v1740_v9 = vpop.permute.xlu1 %1739  ;;  %2286 = vrot.lane.b32.xlu0 %v2275_v57, %s3311_s16 }
 0x7ea   :  { %1745 = vst.msk [vmem:[#allocation2 + $0x3] sm:$0x1] %vm1579_vm3, %v1740_v9 }
 0x7ed   :  { %v1795_v59 = vpop.permute.xlu1 %1794  ;;  %1930 = vrot.lane.b32.xlu0 %v1921_v15, %s3304_s27 }
 0x7ee   :  { %1800 = vst.msk [vmem:[#allocation2 + $0x4] sm:$0x1] %vm1579_vm3, %v1795_v59 }
 0x7f1   :  { %v1850_v33 = vpop.permute.xlu1 %1849  ;;  %1932 = vrot.lane.b32.xlu0 %v1925_v20, %s3304_s27 }
 0x7f2   :  { %1855 = vst.msk [vmem:[#allocation2 + $0x5] sm:$0x1] %vm1579_vm3, %v1850_v33 }
 0x7f5   :  { %2455 = vrot.lane.b32.xlu0 %v2450_v23, %s3307_s29 }
 0x7f9   :  { %2457 = vrot.lane.b32.xlu0 %v2454_v7, %s3307_s29 }
 0x7fd   :  { %v2346_v24 = vpop.permute.xlu1 %2345 }
 0x7fe   :  { %2351 = vst.msk [vmem:[#allocation2 + $0xd] sm:$0x1] %vm1579_vm3, %v2346_v24 }
 0x801   :  { %v1632_v12 = vpop.permute.xlu1 %1631  ;;  %v2401_v25 = vpop.permute.xlu0 %2400 }
 0x802   :  { %1636 = vst.msk [vmem:[#allocation2 + $0x11] sm:$0x1] %vm1579_vm3, %v1632_v12  ;;  %2406 = vst.msk [vmem:[#allocation2 + $0xe] sm:$0x1] %vm1579_vm3, %v2401_v25 }
 0x805   :  { %v1852_v26 = vpop.permute.xlu1 %1851 }
 0x806   :  { %1856 = vst.msk [vmem:[#allocation2 + $0x15] sm:$0x1] %vm1579_vm3, %v1852_v26 }
 0x809   :  { %v2348_v27 = vpop.permute.xlu1 %2347 }
 0x80a   :  { %2352 = vst.msk [vmem:[#allocation2 + $0x1d] sm:$0x1] %vm1579_vm3, %v2348_v27 }
 0x82b   :  { %v1988_v13 = vpop.permute.xlu0 %1987 }
 0x82c   :  { %1993 = vst.msk [vmem:[#allocation2 + $0x7] sm:$0x1] %vm1579_vm3, %v1988_v13 }
 0x82d   :  { %v1990_v11 = vpop.permute.xlu1 %1989 }
 0x82e   :  { %1994 = vst.msk [vmem:[#allocation2 + $0x17] sm:$0x1] %vm1579_vm3, %v1990_v11 }
 0x82f   :  { %v2043_v5 = vpop.permute.xlu0 %2042 }
 0x830   :  { %2048 = vst.msk [vmem:[#allocation2 + $0x8] sm:$0x1] %vm1579_vm3, %v2043_v5 }
 0x833   :  { %v2098_v28 = vpop.permute.xlu0 %2097 }
 0x834   :  { %2103 = vst.msk [vmem:[#allocation2 + $0x9] sm:$0x1] %vm1579_vm3, %v2098_v28 }
 0x835   :  { %v2100_v40 = vpop.permute.xlu1 %2099 }
 0x836   :  { %2104 = vst.msk [vmem:[#allocation2 + $0x19] sm:$0x1] %vm1579_vm3, %v2100_v40 }
 0x837   :  { %v2153_v30 = vpop.permute.xlu0 %2152 }
 0x838   :  { %2158 = vst.msk [vmem:[#allocation2 + $0xa] sm:$0x1] %vm1579_vm3, %v2153_v30 }
 0x839   :  { %v2155_v16 = vpop.permute.xlu1 %2154 }
 0x83a   :  { %2159 = vst.msk [vmem:[#allocation2 + $0x1a] sm:$0x1] %vm1579_vm3, %v2155_v16 }
 0x83b   :  { %v2208_v31 = vpop.permute.xlu0 %2207 }
 0x83c   :  { %2213 = vst.msk [vmem:[#allocation2 + $0xb] sm:$0x1] %vm1579_vm3, %v2208_v31 }
 0x83f   :  { %v1687_v56 = vpop.permute.xlu0 %1686 }
 0x840   :  { %1691 = vst.msk [vmem:[#allocation2 + $0x12] sm:$0x1] %vm1579_vm3, %v1687_v56 }
 0x842   :  { %v2285_v32 = vpop.permute.xlu1 %2284 }
 0x843   :  { %v1742_v34 = vpop.permute.xlu0 %1741 }
 0x844   :  { %1746 = vst.msk [vmem:[#allocation2 + $0x13] sm:$0x1] %vm1579_vm3, %v1742_v34 }
 0x846   :  { %v2289_v17 = vpop.permute.xlu1 %2288 }
 0x847   :  { %v1797_v1 = vpop.permute.xlu0 %1796 }
 0x848   :  { %1801 = vst.msk [vmem:[#allocation2 + $0x14] sm:$0x1] %vm1579_vm3, %v1797_v1 }
 0x84a   :  { %v2291_v41 = vpop.permute.xlu1 %2290 }
 0x84b   :  { %v2293_v36 = vsel %vm2234_vm5, %v2289_v17, %v2291_v41  ;;  %v2045_v60 = vpop.permute.xlu0 %2044 }
 0x84c   :  { %2297 = vst.msk [vmem:[#allocation2 + $0x1c] sm:$0x1] %vm1579_vm3, %v2293_v36  ;;  %2049 = vst.msk [vmem:[#allocation2 + $0x18] sm:$0x1] %vm1579_vm3, %v2045_v60 }
 0x84e   :  { %v2403_v37 = vpop.permute.xlu1 %2402 }
 0x84f   :  { %2407 = vst.msk [vmem:[#allocation2 + $0x1e] sm:$0x1] %vm1579_vm3, %v2403_v37  ;;  %v2210_v39 = vpop.permute.xlu0 %2209 }
 0x850   :  { %2214 = vst.msk [vmem:[#allocation2 + $0x1b] sm:$0x1] %vm1579_vm3, %v2210_v39 }
 0x853   :  { %v1927_v42 = vpop.permute.xlu0 %1926 }
 0x857   :  { %v1929_v43 = vpop.permute.xlu0 %1928 }
 0x858   :  { %v1934_v44 = vsel %vm1876_vm4, %v1927_v42, %v1929_v43 }
 0x859   :  { %1938 = vst.msk [vmem:[#allocation2 + $0x6] sm:$0x1] %vm1579_vm3, %v1934_v44 }
 0x85b   :  { %v2287_v45 = vpop.permute.xlu0 %2286 }
 0x85c   :  { %v2292_v46 = vsel %vm2234_vm5, %v2285_v32, %v2287_v45 }
 0x85d   :  { %2296 = vst.msk [vmem:[#allocation2 + $0xc] sm:$0x1] %vm1579_vm3, %v2292_v46 }
 0x85f   :  { %v1931_v3 = vpop.permute.xlu0 %1930 }
 0x863   :  { %v1933_v47 = vpop.permute.xlu0 %1932 }
 0x864   :  { %v1935_v19 = vsel %vm1876_vm4, %v1931_v3, %v1933_v47 }
 0x865   :  { %1939 = vst.msk [vmem:[#allocation2 + $0x16] sm:$0x1] %vm1579_vm3, %v1935_v19 }
 0x867   :  { %v2456_v49 = vpop.permute.xlu0 %2455 }
 0x868   :  { %2461 = vst.msk [vmem:[#allocation2 + $0xf] sm:$0x1] %vm1579_vm3, %v2456_v49 }
 0x86b   :  { %v2458_v14 = vpop.permute.xlu0 %2457 }
 0x86c   :  { %2462 = vst.msk [vmem:[#allocation2 + $0x1f] sm:$0x1] %vm1579_vm3, %v2458_v14 }
 0x86d   :  { %3279 = shalt.err (!%p3276_p4)
}
 0x86e   :  { %s3280_s9 = scalar_lea.hbm %s4870_s13, 512 }
 0x86f   :  { %p3281_p5 = scmp.ne.s32.totalorder %s4870_s13, %s3280_s9  ;;  %p3284_p6 = scmp.lt.u32.totalorder %s3280_s9, %s4870_s13 }
 0x871   :  { %p3286_p7 = pnand %p3284_p6, %p3281_p5 }
 0x873   :  { %3289 = shalt.err (!%p3286_p7)
}
 0x874   :  { %s3314_s21 = smov 128   ;;  %s3315_s22 = smov 8  }
 0x875   :  { %2474 = dma.vmem_to_hbm [thread:$0]  %s2469_s7, 512, %s4870_s13, [#allocation3], %s3314_s21, %s3314_s21, %s3315_s22  }
 0x876   :  { %3290 = dma.done.wait [#allocation3], 512  }
 0x877   :  { %3291 = vsyncadd [#allocation3], 4294966784 }
 0x878   :  { %2478 = vsyncpa [#allocation3], 1 }

</bundles_post_ra>
